<compile_context>
chip_gen: v7x
topology: tpu7x:2x2x1
jax: 0.10.0
libtpu: 0.0.40
codegen_flags: <defaults>
</compile_context>

<pallas_src>
import numpy as np
import jax
import jax.numpy as jnp
from jax.experimental import pallas as pl
from jax.experimental.pallas import tpu as pltpu

BN_EPS = 1e-5  # PyTorch BatchNorm default eps


# ----------------------------- fused Pallas block -----------------------------

def residual_block_forward(x, params):
    """x: [N, Cin, H, W] f32 (NCHW). Returns [N, Cout, Ho, Wo] f32 (NCHW)."""
    N, Cin, H, W = x.shape
    stride = int(params["stride"])
    Cout = int(params["out_channels"])
    has_proj = "conv_sc_w" in params

    Ho = (H + 2 - 3) // stride + 1
    Wo = (W + 2 - 3) // stride + 1
    Wp2 = Wo + 2                    # row width of the padded-h / output frame
    Lout = Ho * Wp2                 # flat output frame (2 garbage cols per row)
    Lh = (Ho + 3) * Wp2             # zero-padded h slab (+1 safety row)

    xf = x.astype(jnp.float32)

    # ------------- fold eval-mode BatchNorm into weights / biases -------------
    def fold(bn):
        s = bn["gamma"] / jnp.sqrt(bn["var"] + BN_EPS)
        return s, bn["beta"] - bn["mean"] * s

    s1, t1 = fold(params["bn1"])
    s2, t2 = fold(params["bn2"])
    w1f = params["conv1_w"] * s1[:, None, None, None]          # [Cout,Cin,3,3]
    w2f = params["conv2_w"] * s2[:, None, None, None]          # [Cout,Cout,3,3]
    b1 = params["conv1_b"] * s1 + t1
    b2 = params["conv2_b"] * s2 + t2
    if has_proj:
        ssc, tsc = fold(params["bn_sc"])
        wsc = (params["conv_sc_w"][:, :, 0, 0] * ssc[:, None]).astype(jnp.bfloat16)
        b2 = b2 + tsc                                           # shortcut BN shift

    # tap-major weights [9, Cout, Cin_tap] in bf16 for the MXU
    w1_t = jnp.transpose(w1f.reshape(Cout, Cin, 9), (2, 0, 1)).astype(jnp.bfloat16)
    w2_t = jnp.transpose(w2f.reshape(Cout, Cout, 9), (2, 0, 1)).astype(jnp.bfloat16)
    b1c = b1.reshape(Cout, 1).astype(jnp.float32)
    b2c = b2.reshape(Cout, 1).astype(jnp.float32)

    # ------- conv1 tap source: flat padded slab(s) + static tap offsets -------
    if stride == 1:
        xp = jnp.pad(xf, ((0, 0), (0, 0), (1, 2), (1, 1)))     # [N,Cin,H+3,W+2]
        src1 = xp.reshape(N, Cin, (H + 3) * Wp2)
        off1 = tuple(dy * Wp2 + dx for dy in range(3) for dx in range(3))
    else:
        assert stride == 2 and H % 2 == 0 and W % 2 == 0, \
            "stride-2 path assumes even spatial dims"
        xp = jnp.pad(xf, ((0, 0), (0, 0), (1, 1), (1, 1)))     # [N,Cin,H+2,W+2]
        Lph = (Ho + 2) * Wp2
        phases = []
        for a in (0, 1):
            for b in (0, 1):
                ph = xp[:, :, a::2, b::2]                      # [N,Cin,Ho+1,Wo+1]
                ph = jnp.pad(ph, ((0, 0), (0, 0),
                                  (0, (Ho + 2) - ph.shape[2]),
                                  (0, Wp2 - ph.shape[3])))
                phases.append(ph.reshape(N, Cin, Lph))
        src1 = jnp.concatenate(phases, axis=-1)                # [N,Cin,4*Lph]
        off1 = tuple(((dy % 2) * 2 + (dx % 2)) * Lph
                     + (dy // 2) * Wp2 + (dx // 2)
                     for dy in range(3) for dx in range(3))
    src1 = src1.astype(jnp.bfloat16)
    off2 = tuple(dy * Wp2 + dx for dy in range(3) for dx in range(3))
    L1 = src1.shape[-1]

    # ----------------- shortcut source in the flat output frame ---------------
    if has_proj:
        xs = xf[:, :, ::stride, ::stride]                      # [N,Cin,Ho,Wo]
        sc_src = jnp.pad(xs, ((0, 0), (0, 0), (0, 0), (0, 2)))
        sc_src = sc_src.reshape(N, Cin, Lout).astype(jnp.bfloat16)
        Csc = Cin
    else:
        sc_src = jnp.pad(xf, ((0, 0), (0, 0), (0, 0), (0, 2)))
        sc_src = sc_src.reshape(N, Cout, Lout)                 # f32, added as-is
        Csc = Cout

    # mask zeroing the 2 garbage columns per row of the conv1 output slab
    mask = (jnp.arange(Wp2) < Wo).astype(jnp.float32)
    mask = jnp.tile(mask, (Ho,)).reshape(1, Lout)

    # ------------------------------- fused kernel -----------------------------
    def kernel(*refs):
        if has_proj:
            (src1_ref, sc_ref, w1_ref, w2_ref, wsc_ref,
             b1_ref, b2_ref, mask_ref, out_ref, h_ref) = refs
        else:
            (src1_ref, sc_ref, w1_ref, w2_ref,
             b1_ref, b2_ref, mask_ref, out_ref, h_ref) = refs

        # conv1 (+ folded BN1) as 9 shifted-window matmuls, then bias + ReLU
        acc1 = jnp.zeros((Cout, Lout), jnp.float32)
        for t in range(9):
            acc1 += jnp.dot(w1_ref[t], src1_ref[:, pl.ds(off1[t], Lout)],
                            preferred_element_type=jnp.float32)
        h_slab = jnp.maximum(acc1 + b1_ref[...], 0.0) * mask_ref[...]

        # place into zero-padded h frame held in VMEM (never written to HBM)
        h_ref[...] = jnp.zeros(h_ref.shape, h_ref.dtype)
        h_ref[:, pl.ds(Wp2 + 1, Lout)] = h_slab

        # conv2 (+ folded BN2) as 9 shifted-window matmuls over the h slab
        acc2 = jnp.zeros((Cout, Lout), jnp.float32)
        for t in range(9):
            h_tap = h_ref[:, pl.ds(off2[t], Lout)].astype(jnp.bfloat16)
            acc2 += jnp.dot(w2_ref[t], h_tap,
                            preferred_element_type=jnp.float32)

        # shortcut: identity, or folded 1x1-conv + BN projection
        if has_proj:
            sc = jnp.dot(wsc_ref[...], sc_ref[...],
                         preferred_element_type=jnp.float32)
        else:
            sc = sc_ref[...]

        out_ref[...] = jnp.maximum(acc2 + b2_ref[...] + sc, 0.0)

    in_specs = [
        pl.BlockSpec((None, Cin, L1), lambda b: (b, 0, 0)),
        pl.BlockSpec((None, Csc, Lout), lambda b: (b, 0, 0)),
        pl.BlockSpec((9, Cout, Cin), lambda b: (0, 0, 0)),
        pl.BlockSpec((9, Cout, Cout), lambda b: (0, 0, 0)),
    ]
    args = [src1, sc_src, w1_t, w2_t]
    if has_proj:
        in_specs.append(pl.BlockSpec((Cout, Cin), lambda b: (0, 0)))
        args.append(wsc)
    in_specs += [
        pl.BlockSpec((Cout, 1), lambda b: (0, 0)),
        pl.BlockSpec((Cout, 1), lambda b: (0, 0)),
        pl.BlockSpec((1, Lout), lambda b: (0, 0)),
    ]
    args += [b1c, b2c, mask]

    out_flat = pl.pallas_call(
        kernel,
        out_shape=jax.ShapeDtypeStruct((N, Cout, Lout), jnp.float32),
        grid=(N,),
        in_specs=in_specs,
        out_specs=pl.BlockSpec((None, Cout, Lout), lambda b: (b, 0, 0)),
        scratch_shapes=[pltpu.VMEM((Cout, Lh), jnp.float32)],
        compiler_params=pltpu.CompilerParams(
            dimension_semantics=("parallel",)),
    )(*args)

    # drop the 2 garbage columns per row; result is already in NCHW order
    return out_flat.reshape(N, Cout, Ho, Wp2)[:, :, :, :Wo]


# ------------------------------ pure-JAX reference ----------------------------

def _bn_ref(x, bn):
    s = bn["gamma"] / jnp.sqrt(bn["var"] + BN_EPS)
    t = bn["beta"] - bn["mean"] * s
    return x * s[None, :, None, None] + t[None, :, None, None]


def _conv2d_ref(x, w, b, stride, pad):
    out = jax.lax.conv_general_dilated(
        x, w, window_strides=(stride, stride),
        padding=((pad, pad), (pad, pad)),
        dimension_numbers=("NCHW", "OIHW", "NCHW"))
    if b is not None:
        out = out + b[None, :, None, None]
    return out


def residual_block_ref(x, p):
    stride = int(p["stride"])
    h = jax.nn.relu(_bn_ref(
        _conv2d_ref(x, p["conv1_w"], p["conv1_b"], stride, 1), p["bn1"]))
    out = _bn_ref(_conv2d_ref(h, p["conv2_w"], p["conv2_b"], 1, 1), p["bn2"])
    if "conv_sc_w" in p:
        sc = _bn_ref(_conv2d_ref(x, p["conv_sc_w"], None, stride, 0), p["bn_sc"])
    else:
        sc = x
    return jax.nn.relu(out + sc)


# ------------------------------- parameter init -------------------------------

def init_residual_block_params(key, in_channels, out_channels, stride=1):
    keys = iter(jax.random.split(key, 32))
    nk = lambda: next(keys)

    def conv_w(cout, cin, k):
        fan = cin * k * k
        return jax.random.normal(nk(), (cout, cin, k, k), jnp.float32) / np.sqrt(fan)

    def bn(c):
        return {"gamma": jax.random.uniform(nk(), (c,), jnp.float32, 0.5, 1.5),
                "beta": 0.1 * jax.random.normal(nk(), (c,), jnp.float32),
                "mean": 0.1 * jax.random.normal(nk(), (c,), jnp.float32),
                "var": jax.random.uniform(nk(), (c,), jnp.float32, 0.5, 1.5)}

    p = {"stride": stride, "in_channels": in_channels, "out_channels": out_channels,
         "conv1_w": conv_w(out_channels, in_channels, 3),
         "conv1_b": 0.05 * jax.random.normal(nk(), (out_channels,), jnp.float32),
         "bn1": bn(out_channels),
         "conv2_w": conv_w(out_channels, out_channels, 3),
         "conv2_b": 0.05 * jax.random.normal(nk(), (out_channels,), jnp.float32),
         "bn2": bn(out_channels)}
    if stride != 1 or in_channels != out_channels:
        p["conv_sc_w"] = conv_w(out_channels, in_channels, 1)
        p["bn_sc"] = bn(out_channels)
    return p


if __name__ == "__main__":
    key = jax.random.PRNGKey(0)
    kx, k1, k2 = jax.random.split(key, 3)

    x = jax.random.normal(kx, (2, 8, 16, 16), jnp.float32)   # NCHW, like torch

    # identity-shortcut block and projection-shortcut (downsampling) block
    p_id = init_residual_block_params(k1, 8, 8, stride=1)
    p_dn = init_residual_block_params(k2, 8, 16, stride=2)

    fwd_id = jax.jit(lambda inp: residual_block_forward(inp, p_id))
    fwd_dn = jax.jit(lambda inp: residual_block_forward(inp, p_dn))

    out_id = jax.block_until_ready(fwd_id(x))
    out_dn = jax.block_until_ready(fwd_dn(x))

    assert out_id.shape == (2, 8, 16, 16), out_id.shape
    assert out_dn.shape == (2, 16, 8, 8), out_dn.shape
    assert bool(jnp.all(jnp.isfinite(out_id))) and bool(jnp.all(jnp.isfinite(out_dn)))

    # correctness vs. pure-JAX reference (bf16 matmul inputs -> loose tolerance)
    ref_id = residual_block_ref(x, p_id)
    ref_dn = residual_block_ref(x, p_dn)
    np.testing.assert_allclose(np.asarray(out_id), np.asarray(ref_id),
                               rtol=0.1, atol=0.1)
    np.testing.assert_allclose(np.asarray(out_dn), np.asarray(ref_dn),
                               rtol=0.1, atol=0.1)

    # TODO(synk): BatchNorm is implemented in inference mode only (running
    # stats folded into weights; no training-mode batch stats / updates).
    print("KERNEL_OK")
</pallas_src>

<mosaic_0001>
module attributes {stable_mosaic.version = 11 : i64} {
  func.func @kernel(%arg0: i32, %arg1: memref<1x8x342xbf16, #tpu.memory_space<vmem>>, %arg2: memref<1x8x288xf32, #tpu.memory_space<vmem>>, %arg3: memref<9x8x8xbf16, #tpu.memory_space<vmem>>, %arg4: memref<9x8x8xbf16, #tpu.memory_space<vmem>>, %arg5: memref<8x1xf32, #tpu.memory_space<vmem>>, %arg6: memref<8x1xf32, #tpu.memory_space<vmem>>, %arg7: memref<1x288xf32, #tpu.memory_space<vmem>>, %arg8: memref<1x8x288xf32, #tpu.memory_space<vmem>>, %arg9: memref<8x342xf32, #tpu.memory_space<vmem>>) attributes {dimension_semantics = [#tpu.dimension_semantics<parallel>], iteration_bounds = array<i64: 2>, scalar_prefetch = 0 : i64, scratch_operands = 1 : i64, tpu.core_type = #tpu.core_type<tc>, window_params = [{transform_indices = @transform_0, window_bounds = array<i64: 1, 8, 342>}, {transform_indices = @transform_1, window_bounds = array<i64: 1, 8, 288>}, {pipeline_mode = #tpu.pipeline_mode<synchronous>, transform_indices = @transform_2, window_bounds = array<i64: 9, 8, 8>}, {pipeline_mode = #tpu.pipeline_mode<synchronous>, transform_indices = @transform_3, window_bounds = array<i64: 9, 8, 8>}, {pipeline_mode = #tpu.pipeline_mode<synchronous>, transform_indices = @transform_4, window_bounds = array<i64: 8, 1>}, {pipeline_mode = #tpu.pipeline_mode<synchronous>, transform_indices = @transform_5, window_bounds = array<i64: 8, 1>}, {pipeline_mode = #tpu.pipeline_mode<synchronous>, transform_indices = @transform_6, window_bounds = array<i64: 1, 288>}, {transform_indices = @transform_7, window_bounds = array<i64: 1, 8, 288>}]} {
    %cst = arith.constant 0.000000e+00 : f32
    %0 = vector.broadcast %cst : f32 to vector<8x288xf32>
    %c0 = arith.constant 0 : index
    %c0_0 = arith.constant 0 : index
    %c0_1 = arith.constant 0 : index
    %1 = vector.load %arg3[%c0, %c0_0, %c0_1] : memref<9x8x8xbf16, #tpu.memory_space<vmem>>, vector<1x8x8xbf16>
    %2 = vector.shape_cast %1 : vector<1x8x8xbf16> to vector<8x8xbf16>
    %c0_2 = arith.constant 0 : index
    %c0_3 = arith.constant 0 : index
    %c0_4 = arith.constant 0 : index
    %3 = vector.load %arg1[%c0_2, %c0_3, %c0_4] : memref<1x8x342xbf16, #tpu.memory_space<vmem>>, vector<1x8x288xbf16>
    %4 = vector.shape_cast %3 : vector<1x8x288xbf16> to vector<8x288xbf16>
    %cst_5 = arith.constant dense<0.000000e+00> : vector<8x288xf32>
    %5 = tpu.matmul %2, %4, %cst_5 {dimension_numbers = #tpu.dot_dimension_numbers<[1], [0], [0], [1], [0, 0, 1, 1], [], []>} : vector<8x8xbf16>, vector<8x288xbf16>, vector<8x288xf32> -> vector<8x288xf32>
    %6 = arith.addf %0, %5 : vector<8x288xf32>
    %c1 = arith.constant 1 : index
    %c0_6 = arith.constant 0 : index
    %c0_7 = arith.constant 0 : index
    %7 = vector.load %arg3[%c1, %c0_6, %c0_7] : memref<9x8x8xbf16, #tpu.memory_space<vmem>>, vector<1x8x8xbf16>
    %8 = vector.shape_cast %7 : vector<1x8x8xbf16> to vector<8x8xbf16>
    %c0_8 = arith.constant 0 : index
    %c0_9 = arith.constant 0 : index
    %c1_10 = arith.constant 1 : index
    %9 = vector.load %arg1[%c0_8, %c0_9, %c1_10] : memref<1x8x342xbf16, #tpu.memory_space<vmem>>, vector<1x8x288xbf16>
    %10 = vector.shape_cast %9 : vector<1x8x288xbf16> to vector<8x288xbf16>
    %cst_11 = arith.constant dense<0.000000e+00> : vector<8x288xf32>
    %11 = tpu.matmul %8, %10, %cst_11 {dimension_numbers = #tpu.dot_dimension_numbers<[1], [0], [0], [1], [0, 0, 1, 1], [], []>} : vector<8x8xbf16>, vector<8x288xbf16>, vector<8x288xf32> -> vector<8x288xf32>
    %12 = arith.addf %6, %11 : vector<8x288xf32>
    %c2 = arith.constant 2 : index
    %c0_12 = arith.constant 0 : index
    %c0_13 = arith.constant 0 : index
    %13 = vector.load %arg3[%c2, %c0_12, %c0_13] : memref<9x8x8xbf16, #tpu.memory_space<vmem>>, vector<1x8x8xbf16>
    %14 = vector.shape_cast %13 : vector<1x8x8xbf16> to vector<8x8xbf16>
    %c0_14 = arith.constant 0 : index
    %c0_15 = arith.constant 0 : index
    %c2_16 = arith.constant 2 : index
    %15 = vector.load %arg1[%c0_14, %c0_15, %c2_16] : memref<1x8x342xbf16, #tpu.memory_space<vmem>>, vector<1x8x288xbf16>
    %16 = vector.shape_cast %15 : vector<1x8x288xbf16> to vector<8x288xbf16>
    %cst_17 = arith.constant dense<0.000000e+00> : vector<8x288xf32>
    %17 = tpu.matmul %14, %16, %cst_17 {dimension_numbers = #tpu.dot_dimension_numbers<[1], [0], [0], [1], [0, 0, 1, 1], [], []>} : vector<8x8xbf16>, vector<8x288xbf16>, vector<8x288xf32> -> vector<8x288xf32>
    %18 = arith.addf %12, %17 : vector<8x288xf32>
    %c3 = arith.constant 3 : index
    %c0_18 = arith.constant 0 : index
    %c0_19 = arith.constant 0 : index
    %19 = vector.load %arg3[%c3, %c0_18, %c0_19] : memref<9x8x8xbf16, #tpu.memory_space<vmem>>, vector<1x8x8xbf16>
    %20 = vector.shape_cast %19 : vector<1x8x8xbf16> to vector<8x8xbf16>
    %c0_20 = arith.constant 0 : index
    %c0_21 = arith.constant 0 : index
    %c18 = arith.constant 18 : index
    %21 = vector.load %arg1[%c0_20, %c0_21, %c18] : memref<1x8x342xbf16, #tpu.memory_space<vmem>>, vector<1x8x288xbf16>
    %22 = vector.shape_cast %21 : vector<1x8x288xbf16> to vector<8x288xbf16>
    %cst_22 = arith.constant dense<0.000000e+00> : vector<8x288xf32>
    %23 = tpu.matmul %20, %22, %cst_22 {dimension_numbers = #tpu.dot_dimension_numbers<[1], [0], [0], [1], [0, 0, 1, 1], [], []>} : vector<8x8xbf16>, vector<8x288xbf16>, vector<8x288xf32> -> vector<8x288xf32>
    %24 = arith.addf %18, %23 : vector<8x288xf32>
    %c4 = arith.constant 4 : index
    %c0_23 = arith.constant 0 : index
    %c0_24 = arith.constant 0 : index
    %25 = vector.load %arg3[%c4, %c0_23, %c0_24] : memref<9x8x8xbf16, #tpu.memory_space<vmem>>, vector<1x8x8xbf16>
    %26 = vector.shape_cast %25 : vector<1x8x8xbf16> to vector<8x8xbf16>
    %c0_25 = arith.constant 0 : index
    %c0_26 = arith.constant 0 : index
    %c19 = arith.constant 19 : index
    %27 = vector.load %arg1[%c0_25, %c0_26, %c19] : memref<1x8x342xbf16, #tpu.memory_space<vmem>>, vector<1x8x288xbf16>
    %28 = vector.shape_cast %27 : vector<1x8x288xbf16> to vector<8x288xbf16>
    %cst_27 = arith.constant dense<0.000000e+00> : vector<8x288xf32>
    %29 = tpu.matmul %26, %28, %cst_27 {dimension_numbers = #tpu.dot_dimension_numbers<[1], [0], [0], [1], [0, 0, 1, 1], [], []>} : vector<8x8xbf16>, vector<8x288xbf16>, vector<8x288xf32> -> vector<8x288xf32>
    %30 = arith.addf %24, %29 : vector<8x288xf32>
    %c5 = arith.constant 5 : index
    %c0_28 = arith.constant 0 : index
    %c0_29 = arith.constant 0 : index
    %31 = vector.load %arg3[%c5, %c0_28, %c0_29] : memref<9x8x8xbf16, #tpu.memory_space<vmem>>, vector<1x8x8xbf16>
    %32 = vector.shape_cast %31 : vector<1x8x8xbf16> to vector<8x8xbf16>
    %c0_30 = arith.constant 0 : index
    %c0_31 = arith.constant 0 : index
    %c20 = arith.constant 20 : index
    %33 = vector.load %arg1[%c0_30, %c0_31, %c20] : memref<1x8x342xbf16, #tpu.memory_space<vmem>>, vector<1x8x288xbf16>
    %34 = vector.shape_cast %33 : vector<1x8x288xbf16> to vector<8x288xbf16>
    %cst_32 = arith.constant dense<0.000000e+00> : vector<8x288xf32>
    %35 = tpu.matmul %32, %34, %cst_32 {dimension_numbers = #tpu.dot_dimension_numbers<[1], [0], [0], [1], [0, 0, 1, 1], [], []>} : vector<8x8xbf16>, vector<8x288xbf16>, vector<8x288xf32> -> vector<8x288xf32>
    %36 = arith.addf %30, %35 : vector<8x288xf32>
    %c6 = arith.constant 6 : index
    %c0_33 = arith.constant 0 : index
    %c0_34 = arith.constant 0 : index
    %37 = vector.load %arg3[%c6, %c0_33, %c0_34] : memref<9x8x8xbf16, #tpu.memory_space<vmem>>, vector<1x8x8xbf16>
    %38 = vector.shape_cast %37 : vector<1x8x8xbf16> to vector<8x8xbf16>
    %c0_35 = arith.constant 0 : index
    %c0_36 = arith.constant 0 : index
    %c36 = arith.constant 36 : index
    %39 = vector.load %arg1[%c0_35, %c0_36, %c36] : memref<1x8x342xbf16, #tpu.memory_space<vmem>>, vector<1x8x288xbf16>
    %40 = vector.shape_cast %39 : vector<1x8x288xbf16> to vector<8x288xbf16>
    %cst_37 = arith.constant dense<0.000000e+00> : vector<8x288xf32>
    %41 = tpu.matmul %38, %40, %cst_37 {dimension_numbers = #tpu.dot_dimension_numbers<[1], [0], [0], [1], [0, 0, 1, 1], [], []>} : vector<8x8xbf16>, vector<8x288xbf16>, vector<8x288xf32> -> vector<8x288xf32>
    %42 = arith.addf %36, %41 : vector<8x288xf32>
    %c7 = arith.constant 7 : index
    %c0_38 = arith.constant 0 : index
    %c0_39 = arith.constant 0 : index
    %43 = vector.load %arg3[%c7, %c0_38, %c0_39] : memref<9x8x8xbf16, #tpu.memory_space<vmem>>, vector<1x8x8xbf16>
    %44 = vector.shape_cast %43 : vector<1x8x8xbf16> to vector<8x8xbf16>
    %c0_40 = arith.constant 0 : index
    %c0_41 = arith.constant 0 : index
    %c37 = arith.constant 37 : index
    %45 = vector.load %arg1[%c0_40, %c0_41, %c37] : memref<1x8x342xbf16, #tpu.memory_space<vmem>>, vector<1x8x288xbf16>
    %46 = vector.shape_cast %45 : vector<1x8x288xbf16> to vector<8x288xbf16>
    %cst_42 = arith.constant dense<0.000000e+00> : vector<8x288xf32>
    %47 = tpu.matmul %44, %46, %cst_42 {dimension_numbers = #tpu.dot_dimension_numbers<[1], [0], [0], [1], [0, 0, 1, 1], [], []>} : vector<8x8xbf16>, vector<8x288xbf16>, vector<8x288xf32> -> vector<8x288xf32>
    %48 = arith.addf %42, %47 : vector<8x288xf32>
    %c8 = arith.constant 8 : index
    %c0_43 = arith.constant 0 : index
    %c0_44 = arith.constant 0 : index
    %49 = vector.load %arg3[%c8, %c0_43, %c0_44] : memref<9x8x8xbf16, #tpu.memory_space<vmem>>, vector<1x8x8xbf16>
    %50 = vector.shape_cast %49 : vector<1x8x8xbf16> to vector<8x8xbf16>
    %c0_45 = arith.constant 0 : index
    %c0_46 = arith.constant 0 : index
    %c38 = arith.constant 38 : index
    %51 = vector.load %arg1[%c0_45, %c0_46, %c38] : memref<1x8x342xbf16, #tpu.memory_space<vmem>>, vector<1x8x288xbf16>
    %52 = vector.shape_cast %51 : vector<1x8x288xbf16> to vector<8x288xbf16>
    %cst_47 = arith.constant dense<0.000000e+00> : vector<8x288xf32>
    %53 = tpu.matmul %50, %52, %cst_47 {dimension_numbers = #tpu.dot_dimension_numbers<[1], [0], [0], [1], [0, 0, 1, 1], [], []>} : vector<8x8xbf16>, vector<8x288xbf16>, vector<8x288xf32> -> vector<8x288xf32>
    %54 = arith.addf %48, %53 : vector<8x288xf32>
    %c0_48 = arith.constant 0 : index
    %c0_49 = arith.constant 0 : index
    %55 = vector.load %arg5[%c0_48, %c0_49] : memref<8x1xf32, #tpu.memory_space<vmem>>, vector<8x1xf32>
    %56 = vector.broadcast %55 : vector<8x1xf32> to vector<8x288xf32>
    %57 = arith.addf %54, %56 : vector<8x288xf32>
    %cst_50 = arith.constant 0.000000e+00 : f32
    %58 = vector.broadcast %cst_50 : f32 to vector<8x288xf32>
    %59 = arith.maximumf %57, %58 : vector<8x288xf32>
    %c0_51 = arith.constant 0 : index
    %c0_52 = arith.constant 0 : index
    %60 = vector.load %arg7[%c0_51, %c0_52] : memref<1x288xf32, #tpu.memory_space<vmem>>, vector<1x288xf32>
    %61 = vector.broadcast %60 : vector<1x288xf32> to vector<8x288xf32>
    %62 = arith.mulf %59, %61 : vector<8x288xf32>
    %cst_53 = arith.constant 0.000000e+00 : f32
    %63 = vector.broadcast %cst_53 : f32 to vector<8x342xf32>
    %c0_54 = arith.constant 0 : index
    %c0_55 = arith.constant 0 : index
    %64 = vector.load %arg9[%c0_54, %c0_55] : memref<8x342xf32, #tpu.memory_space<vmem>>, vector<8x342xf32>
    tpu.vector_store %arg9[%c0_54, %c0_55], %63 {strides = array<i32>} : memref<8x342xf32, #tpu.memory_space<vmem>>, vector<8x342xf32>,
    %c0_56 = arith.constant 0 : index
    %c19_57 = arith.constant 19 : index
    %65 = vector.load %arg9[%c0_56, %c19_57] : memref<8x342xf32, #tpu.memory_space<vmem>>, vector<8x288xf32>
    tpu.vector_store %arg9[%c0_56, %c19_57], %62 {strides = array<i32>} : memref<8x342xf32, #tpu.memory_space<vmem>>, vector<8x288xf32>,
    %cst_58 = arith.constant 0.000000e+00 : f32
    %66 = vector.broadcast %cst_58 : f32 to vector<8x288xf32>
    %c0_59 = arith.constant 0 : index
    %c0_60 = arith.constant 0 : index
    %67 = vector.load %arg9[%c0_59, %c0_60] : memref<8x342xf32, #tpu.memory_space<vmem>>, vector<8x288xf32>
    %68 = arith.truncf %67 : vector<8x288xf32> to vector<8x288xbf16>
    %c0_61 = arith.constant 0 : index
    %c0_62 = arith.constant 0 : index
    %c0_63 = arith.constant 0 : index
    %69 = vector.load %arg4[%c0_61, %c0_62, %c0_63] : memref<9x8x8xbf16, #tpu.memory_space<vmem>>, vector<1x8x8xbf16>
    %70 = vector.shape_cast %69 : vector<1x8x8xbf16> to vector<8x8xbf16>
    %cst_64 = arith.constant dense<0.000000e+00> : vector<8x288xf32>
    %71 = tpu.matmul %70, %68, %cst_64 {dimension_numbers = #tpu.dot_dimension_numbers<[1], [0], [0], [1], [0, 0, 1, 1], [], []>} : vector<8x8xbf16>, vector<8x288xbf16>, vector<8x288xf32> -> vector<8x288xf32>
    %72 = arith.addf %66, %71 : vector<8x288xf32>
    %c0_65 = arith.constant 0 : index
    %c1_66 = arith.constant 1 : index
    %73 = vector.load %arg9[%c0_65, %c1_66] : memref<8x342xf32, #tpu.memory_space<vmem>>, vector<8x288xf32>
    %74 = arith.truncf %73 : vector<8x288xf32> to vector<8x288xbf16>
    %c1_67 = arith.constant 1 : index
    %c0_68 = arith.constant 0 : index
    %c0_69 = arith.constant 0 : index
    %75 = vector.load %arg4[%c1_67, %c0_68, %c0_69] : memref<9x8x8xbf16, #tpu.memory_space<vmem>>, vector<1x8x8xbf16>
    %76 = vector.shape_cast %75 : vector<1x8x8xbf16> to vector<8x8xbf16>
    %cst_70 = arith.constant dense<0.000000e+00> : vector<8x288xf32>
    %77 = tpu.matmul %76, %74, %cst_70 {dimension_numbers = #tpu.dot_dimension_numbers<[1], [0], [0], [1], [0, 0, 1, 1], [], []>} : vector<8x8xbf16>, vector<8x288xbf16>, vector<8x288xf32> -> vector<8x288xf32>
    %78 = arith.addf %72, %77 : vector<8x288xf32>
    %c0_71 = arith.constant 0 : index
    %c2_72 = arith.constant 2 : index
    %79 = vector.load %arg9[%c0_71, %c2_72] : memref<8x342xf32, #tpu.memory_space<vmem>>, vector<8x288xf32>
    %80 = arith.truncf %79 : vector<8x288xf32> to vector<8x288xbf16>
    %c2_73 = arith.constant 2 : index
    %c0_74 = arith.constant 0 : index
    %c0_75 = arith.constant 0 : index
    %81 = vector.load %arg4[%c2_73, %c0_74, %c0_75] : memref<9x8x8xbf16, #tpu.memory_space<vmem>>, vector<1x8x8xbf16>
    %82 = vector.shape_cast %81 : vector<1x8x8xbf16> to vector<8x8xbf16>
    %cst_76 = arith.constant dense<0.000000e+00> : vector<8x288xf32>
    %83 = tpu.matmul %82, %80, %cst_76 {dimension_numbers = #tpu.dot_dimension_numbers<[1], [0], [0], [1], [0, 0, 1, 1], [], []>} : vector<8x8xbf16>, vector<8x288xbf16>, vector<8x288xf32> -> vector<8x288xf32>
    %84 = arith.addf %78, %83 : vector<8x288xf32>
    %c0_77 = arith.constant 0 : index
    %c18_78 = arith.constant 18 : index
    %85 = vector.load %arg9[%c0_77, %c18_78] : memref<8x342xf32, #tpu.memory_space<vmem>>, vector<8x288xf32>
    %86 = arith.truncf %85 : vector<8x288xf32> to vector<8x288xbf16>
    %c3_79 = arith.constant 3 : index
    %c0_80 = arith.constant 0 : index
    %c0_81 = arith.constant 0 : index
    %87 = vector.load %arg4[%c3_79, %c0_80, %c0_81] : memref<9x8x8xbf16, #tpu.memory_space<vmem>>, vector<1x8x8xbf16>
    %88 = vector.shape_cast %87 : vector<1x8x8xbf16> to vector<8x8xbf16>
    %cst_82 = arith.constant dense<0.000000e+00> : vector<8x288xf32>
    %89 = tpu.matmul %88, %86, %cst_82 {dimension_numbers = #tpu.dot_dimension_numbers<[1], [0], [0], [1], [0, 0, 1, 1], [], []>} : vector<8x8xbf16>, vector<8x288xbf16>, vector<8x288xf32> -> vector<8x288xf32>
    %90 = arith.addf %84, %89 : vector<8x288xf32>
    %c0_83 = arith.constant 0 : index
    %c19_84 = arith.constant 19 : index
    %91 = vector.load %arg9[%c0_83, %c19_84] : memref<8x342xf32, #tpu.memory_space<vmem>>, vector<8x288xf32>
    %92 = arith.truncf %91 : vector<8x288xf32> to vector<8x288xbf16>
    %c4_85 = arith.constant 4 : index
    %c0_86 = arith.constant 0 : index
    %c0_87 = arith.constant 0 : index
    %93 = vector.load %arg4[%c4_85, %c0_86, %c0_87] : memref<9x8x8xbf16, #tpu.memory_space<vmem>>, vector<1x8x8xbf16>
    %94 = vector.shape_cast %93 : vector<1x8x8xbf16> to vector<8x8xbf16>
    %cst_88 = arith.constant dense<0.000000e+00> : vector<8x288xf32>
    %95 = tpu.matmul %94, %92, %cst_88 {dimension_numbers = #tpu.dot_dimension_numbers<[1], [0], [0], [1], [0, 0, 1, 1], [], []>} : vector<8x8xbf16>, vector<8x288xbf16>, vector<8x288xf32> -> vector<8x288xf32>
    %96 = arith.addf %90, %95 : vector<8x288xf32>
    %c0_89 = arith.constant 0 : index
    %c20_90 = arith.constant 20 : index
    %97 = vector.load %arg9[%c0_89, %c20_90] : memref<8x342xf32, #tpu.memory_space<vmem>>, vector<8x288xf32>
    %98 = arith.truncf %97 : vector<8x288xf32> to vector<8x288xbf16>
    %c5_91 = arith.constant 5 : index
    %c0_92 = arith.constant 0 : index
    %c0_93 = arith.constant 0 : index
    %99 = vector.load %arg4[%c5_91, %c0_92, %c0_93] : memref<9x8x8xbf16, #tpu.memory_space<vmem>>, vector<1x8x8xbf16>
    %100 = vector.shape_cast %99 : vector<1x8x8xbf16> to vector<8x8xbf16>
    %cst_94 = arith.constant dense<0.000000e+00> : vector<8x288xf32>
    %101 = tpu.matmul %100, %98, %cst_94 {dimension_numbers = #tpu.dot_dimension_numbers<[1], [0], [0], [1], [0, 0, 1, 1], [], []>} : vector<8x8xbf16>, vector<8x288xbf16>, vector<8x288xf32> -> vector<8x288xf32>
    %102 = arith.addf %96, %101 : vector<8x288xf32>
    %c0_95 = arith.constant 0 : index
    %c36_96 = arith.constant 36 : index
    %103 = vector.load %arg9[%c0_95, %c36_96] : memref<8x342xf32, #tpu.memory_space<vmem>>, vector<8x288xf32>
    %104 = arith.truncf %103 : vector<8x288xf32> to vector<8x288xbf16>
    %c6_97 = arith.constant 6 : index
    %c0_98 = arith.constant 0 : index
    %c0_99 = arith.constant 0 : index
    %105 = vector.load %arg4[%c6_97, %c0_98, %c0_99] : memref<9x8x8xbf16, #tpu.memory_space<vmem>>, vector<1x8x8xbf16>
    %106 = vector.shape_cast %105 : vector<1x8x8xbf16> to vector<8x8xbf16>
    %cst_100 = arith.constant dense<0.000000e+00> : vector<8x288xf32>
    %107 = tpu.matmul %106, %104, %cst_100 {dimension_numbers = #tpu.dot_dimension_numbers<[1], [0], [0], [1], [0, 0, 1, 1], [], []>} : vector<8x8xbf16>, vector<8x288xbf16>, vector<8x288xf32> -> vector<8x288xf32>
    %108 = arith.addf %102, %107 : vector<8x288xf32>
    %c0_101 = arith.constant 0 : index
    %c37_102 = arith.constant 37 : index
    %109 = vector.load %arg9[%c0_101, %c37_102] : memref<8x342xf32, #tpu.memory_space<vmem>>, vector<8x288xf32>
    %110 = arith.truncf %109 : vector<8x288xf32> to vector<8x288xbf16>
    %c7_103 = arith.constant 7 : index
    %c0_104 = arith.constant 0 : index
    %c0_105 = arith.constant 0 : index
    %111 = vector.load %arg4[%c7_103, %c0_104, %c0_105] : memref<9x8x8xbf16, #tpu.memory_space<vmem>>, vector<1x8x8xbf16>
    %112 = vector.shape_cast %111 : vector<1x8x8xbf16> to vector<8x8xbf16>
    %cst_106 = arith.constant dense<0.000000e+00> : vector<8x288xf32>
    %113 = tpu.matmul %112, %110, %cst_106 {dimension_numbers = #tpu.dot_dimension_numbers<[1], [0], [0], [1], [0, 0, 1, 1], [], []>} : vector<8x8xbf16>, vector<8x288xbf16>, vector<8x288xf32> -> vector<8x288xf32>
    %114 = arith.addf %108, %113 : vector<8x288xf32>
    %c0_107 = arith.constant 0 : index
    %c38_108 = arith.constant 38 : index
    %115 = vector.load %arg9[%c0_107, %c38_108] : memref<8x342xf32, #tpu.memory_space<vmem>>, vector<8x288xf32>
    %116 = arith.truncf %115 : vector<8x288xf32> to vector<8x288xbf16>
    %c8_109 = arith.constant 8 : index
    %c0_110 = arith.constant 0 : index
    %c0_111 = arith.constant 0 : index
    %117 = vector.load %arg4[%c8_109, %c0_110, %c0_111] : memref<9x8x8xbf16, #tpu.memory_space<vmem>>, vector<1x8x8xbf16>
    %118 = vector.shape_cast %117 : vector<1x8x8xbf16> to vector<8x8xbf16>
    %cst_112 = arith.constant dense<0.000000e+00> : vector<8x288xf32>
    %119 = tpu.matmul %118, %116, %cst_112 {dimension_numbers = #tpu.dot_dimension_numbers<[1], [0], [0], [1], [0, 0, 1, 1], [], []>} : vector<8x8xbf16>, vector<8x288xbf16>, vector<8x288xf32> -> vector<8x288xf32>
    %120 = arith.addf %114, %119 : vector<8x288xf32>
    %c0_113 = arith.constant 0 : index
    %c0_114 = arith.constant 0 : index
    %c0_115 = arith.constant 0 : index
    %121 = vector.load %arg2[%c0_113, %c0_114, %c0_115] : memref<1x8x288xf32, #tpu.memory_space<vmem>>, vector<1x8x288xf32>
    %122 = vector.shape_cast %121 : vector<1x8x288xf32> to vector<8x288xf32>
    %c0_116 = arith.constant 0 : index
    %c0_117 = arith.constant 0 : index
    %123 = vector.load %arg6[%c0_116, %c0_117] : memref<8x1xf32, #tpu.memory_space<vmem>>, vector<8x1xf32>
    %124 = vector.broadcast %123 : vector<8x1xf32> to vector<8x288xf32>
    %125 = arith.addf %120, %124 : vector<8x288xf32>
    %126 = arith.addf %125, %122 : vector<8x288xf32>
    %cst_118 = arith.constant 0.000000e+00 : f32
    %127 = vector.broadcast %cst_118 : f32 to vector<8x288xf32>
    %128 = arith.maximumf %126, %127 : vector<8x288xf32>
    %c0_119 = arith.constant 0 : index
    %c0_120 = arith.constant 0 : index
    %c0_121 = arith.constant 0 : index
    %129 = vector.load %arg8[%c0_119, %c0_120, %c0_121] : memref<1x8x288xf32, #tpu.memory_space<vmem>>, vector<1x8x288xf32>
    %130 = vector.shape_cast %129 : vector<1x8x288xf32> to vector<8x288xf32>
    %131 = vector.shape_cast %128 : vector<8x288xf32> to vector<1x8x288xf32>
    tpu.vector_store %arg8[%c0_119, %c0_120, %c0_121], %131 {strides = array<i32>} : memref<1x8x288xf32, #tpu.memory_space<vmem>>, vector<1x8x288xf32>,
    return
  }
  func.func @transform_0(%arg0: i32) -> (i32, i32, i32) {
    %c0_i32 = arith.constant 0 : i32
    %c0_i32_0 = arith.constant 0 : i32
    %c0_i32_1 = arith.constant 0 : i32
    return %arg0, %c0_i32, %c0_i32_0 : i32, i32, i32
  }
  func.func @transform_1(%arg0: i32) -> (i32, i32, i32) {
    %c0_i32 = arith.constant 0 : i32
    %c0_i32_0 = arith.constant 0 : i32
    %c0_i32_1 = arith.constant 0 : i32
    return %arg0, %c0_i32, %c0_i32_0 : i32, i32, i32
  }
  func.func @transform_2(%arg0: i32) -> (i32, i32, i32) {
    %c0_i32 = arith.constant 0 : i32
    %c0_i32_0 = arith.constant 0 : i32
    %c0_i32_1 = arith.constant 0 : i32
    %c0_i32_2 = arith.constant 0 : i32
    return %c0_i32, %c0_i32_0, %c0_i32_1 : i32, i32, i32
  }
  func.func @transform_3(%arg0: i32) -> (i32, i32, i32) {
    %c0_i32 = arith.constant 0 : i32
    %c0_i32_0 = arith.constant 0 : i32
    %c0_i32_1 = arith.constant 0 : i32
    %c0_i32_2 = arith.constant 0 : i32
    return %c0_i32, %c0_i32_0, %c0_i32_1 : i32, i32, i32
  }
  func.func @transform_4(%arg0: i32) -> (i32, i32) {
    %c0_i32 = arith.constant 0 : i32
    %c0_i32_0 = arith.constant 0 : i32
    %c0_i32_1 = arith.constant 0 : i32
    return %c0_i32, %c0_i32_0 : i32, i32
  }
  func.func @transform_5(%arg0: i32) -> (i32, i32) {
    %c0_i32 = arith.constant 0 : i32
    %c0_i32_0 = arith.constant 0 : i32
    %c0_i32_1 = arith.constant 0 : i32
    return %c0_i32, %c0_i32_0 : i32, i32
  }
  func.func @transform_6(%arg0: i32) -> (i32, i32) {
    %c0_i32 = arith.constant 0 : i32
    %c0_i32_0 = arith.constant 0 : i32
    %c0_i32_1 = arith.constant 0 : i32
    return %c0_i32, %c0_i32_0 : i32, i32
  }
  func.func @transform_7(%arg0: i32) -> (i32, i32, i32) {
    %c0_i32 = arith.constant 0 : i32
    %c0_i32_0 = arith.constant 0 : i32
    %c0_i32_1 = arith.constant 0 : i32
    return %arg0, %c0_i32, %c0_i32_0 : i32, i32, i32
  }
}

</mosaic_0001>

<bundles_post_ra>
// kernel: tile.8
= control target key start
LH: loop header
LB: loop body
LE: loop exit
PB: predicated region body
PF: predicated region fallthrough
CT: control target
= control target key end

     0   :  { %s28_s0 = inlined_call_operand.vmem [shape: f32[18], index: 0, kind: input, shape index: {}]   ;;  %s29_s1 = inlined_call_operand.vmem [shape: f32[16,18], index: 1, kind: output, shape index: {}]  }
   0x1   :  { %v4_v0 = vld [vmem:[%s28_s0] ss:$0 sm:$0xff] }
   0x2   :  { %5 = vst [vmem:[%s29_s1] sm:$0xff] %v4_v0  ;;  %8 = vst [vmem:[%s29_s1 + $0x8] sm:$0xff] %v4_v0 }

// kernel: tile.9
= control target key start
LH: loop header
LB: loop body
LE: loop exit
PB: predicated region body
PF: predicated region fallthrough
CT: control target
= control target key end

     0   :  { %vm9_vm0 = vcmask 15360   ;;  %vm22_vm1 = vcmask 31744   ;;  %s169_s14 = smov 126   ;;  %s170_s15 = smov 108   ;;  %vm3_vm2 = vcmask 146432   ;;  %vm13_vm3 = vcmask 130048   ;;  %s257_s0 = inlined_call_operand.vmem [shape: f32[16,18], index: 0, kind: input, shape index: {}]   ;;  %s258_s1 = inlined_call_operand.vmem [shape: f32[1,288], index: 1, kind: output, shape index: {}]  }
   0x1   :  { %v135_v0 = vld [vmem:[%s257_s0 + $0x7] sm:$0x1]   ;;  %v139_v3 = vld [vmem:[%s257_s0 + $0x6] sm:$0x1]   ;;  %v137_v4 = vld [vmem:[%s257_s0 + $0xe] sm:$0x1]  }
   0x2   :  { %v136_v1 = vld [vmem:[%s257_s0 + $0x7] sm:$0x1]   ;;  %34 = vrot.lane.b32.xlu1 %v139_v3, %s170_s15  ;;  %v138_v5 = vld [vmem:[%s257_s0 + $0xe] sm:$0x1]   ;;  %v140_v7 = vld [vmem:[%s257_s0 + $0xd] sm:$0x1]  }
   0x3   :  { %v10_v2 = vsel %vm9_vm0, %v136_v1, %v135_v0  ;;  %v23_v6 = vsel %vm22_vm1, %v138_v5, %v137_v4  ;;  %s171_s20 = smov 124   ;;  %s172_s21 = smov 106   ;;  %v141_v8 = vld [vmem:[%s257_s0 + $0x5] sm:$0x1]   ;;  %v142_v9 = vld [vmem:[%s257_s0 + $0xc] sm:$0x1]  }
   0x4   :  { %11 = vrot.lane.b32.xlu0 %v10_v2, %s169_s14  ;;  %v2_v10 = vld [vmem:[%s257_s0] sm:$0x1]   ;;  %s173_s28 = smov 90   ;;  %s174_s29 = smov 88   ;;  %v143_v11 = vld [vmem:[%s257_s0 + $0x4] sm:$0x1]  }
   0x5   :  { %4 = vst.msk [vmem:[#allocation0] sm:$0x1] %vm3_vm2, %v2_v10   ;;  %v144_v12 = vld [vmem:[%s257_s0 + $0xb] sm:$0x1]   ;;  %s175_s5 = smov 72   ;;  %s176_s6 = smov 70  }
   0x6   :  { %40 = vrot.lane.b32.xlu1 %v140_v7, %s172_s21  ;;  %v145_v13 = vld [vmem:[%s257_s0 + $0x3] sm:$0x1]   ;;  %v146_v14 = vld [vmem:[%s257_s0 + $0xa] sm:$0x1]   ;;  %s177_s11 = smov 54   ;;  %s178_s12 = smov 52  }
   0x7   :  { %v147_v15 = vld [vmem:[%s257_s0 + $0x2] sm:$0x1]   ;;  %v148_v16 = vld [vmem:[%s257_s0 + $0x9] sm:$0x1]   ;;  %s179_s17 = smov 36   ;;  %s180_s18 = smov 34  }
   0x8   :  { %24 = vrot.lane.b32.xlu0 %v23_v6, %s171_s20  ;;  %v149_v17 = vld [vmem:[%s257_s0 + $0x1] sm:$0x1]   ;;  %v150_v18 = vld [vmem:[%s257_s0 + $0x8] sm:$0x1]   ;;  %s181_s23 = smov 18   ;;  %s182_s24 = smov 16  }
   0x9   :  { %v151_v19 = vld [vmem:[%s257_s0 + $0xf] sm:$0x1]   ;;  %s183_s0 = smov 14   ;;  %vm16_vm4 = vcmask 1048560   ;;  %vm36_vm5 = vcmask 1032032   ;;  %vm26_vm6 = vcmask 113664  }
   0xa   :  { %53 = vrot.lane.b32.xlu1 %v142_v9, %s174_s29  ;;  %vm29_vm7 = vcmask 1048544   ;;  %vm42_vm8 = vcmask 1015632   ;;  %vm49_vm9 = vcmask 884432   ;;  %vm55_vm10 = vcmask 868032  }
   0xb   :  { %vm62_vm11 = vcmask 736832   ;;  %vm68_vm12 = vcmask 720432   ;;  %vm75_vm13 = vcmask 589232   ;;  %vm81_vm14 = vcmask 572832  }
   0xc   :  { %47 = vrot.lane.b32.xlu0 %v141_v8, %s173_s28  ;;  %vm88_vm15 = vcmask 441632   ;;  %vm94_vm0 = vcmask 425232   ;;  %vm101_vm1 = vcmask 294032   ;;  %vm107_vm2 = vcmask 277632  }
   0xe   :  { %66 = vrot.lane.b32.xlu1 %v144_v12, %s176_s6 }
  0x10   :  { %60 = vrot.lane.b32.xlu0 %v143_v11, %s175_s5 }
  0x12   :  { %79 = vrot.lane.b32.xlu1 %v146_v14, %s178_s12 }
  0x14   :  { %73 = vrot.lane.b32.xlu0 %v145_v13, %s177_s11 }
  0x16   :  { %92 = vrot.lane.b32.xlu1 %v148_v16, %s180_s18 }
  0x18   :  { %86 = vrot.lane.b32.xlu0 %v147_v15, %s179_s17 }
  0x1a   :  { %105 = vrot.lane.b32.xlu1 %v150_v18, %s182_s24 }
  0x1c   :  { %99 = vrot.lane.b32.xlu0 %v149_v17, %s181_s23 }
  0x20   :  { %112 = vrot.lane.b32.xlu0 %v151_v19, %s183_s0 }
  0x74   :  { %v35_v21 = vpop.permute.xlu1 %34  }
  0x76   :  { %v12_v20 = vpop.permute.xlu0 %11  }
  0x77   :  { %15 = vst.msk [vmem:[#allocation0 + $0x8] sm:$0x1] %vm13_vm3, %v12_v20   ;;  %vm114_vm3 = vcmask 261232  }
  0x78   :  { %17 = vst.msk [vmem:[#allocation0] sm:$0x1] %vm16_vm4, %v12_v20   ;;  %v41_v23 = vpop.permute.xlu1 %40  }
  0x79   :  { %37 = vst.msk [vmem:[#allocation0] sm:$0x1] %vm36_vm5, %v35_v21  }
  0x7a   :  { %v25_v22 = vpop.permute.xlu0 %24  }
  0x7b   :  { %28 = vst.msk [vmem:[#allocation0 + $0x10] sm:$0x1] %vm26_vm6, %v25_v22  }
  0x7c   :  { %31 = vst.msk [vmem:[#allocation0 + $0x8] sm:$0x1] %vm29_vm7, %v25_v22   ;;  %v54_v25 = vpop.permute.xlu1 %53  }
  0x7d   :  { %44 = vst.msk [vmem:[#allocation0 + $0x8] sm:$0x1] %vm42_vm8, %v41_v23  }
  0x7e   :  { %v48_v24 = vpop.permute.xlu0 %47   ;;  %57 = vst.msk [vmem:[#allocation0 + $0x8] sm:$0x1] %vm55_vm10, %v54_v25  }
  0x7f   :  { %50 = vst.msk [vmem:[#allocation0] sm:$0x1] %vm49_vm9, %v48_v24  }
  0x80   :  { %v67_v27 = vpop.permute.xlu1 %66  }
  0x81   :  { %70 = vst.msk [vmem:[#allocation0 + $0x8] sm:$0x1] %vm68_vm12, %v67_v27  }
  0x82   :  { %v61_v26 = vpop.permute.xlu0 %60  }
  0x83   :  { %63 = vst.msk [vmem:[#allocation0] sm:$0x1] %vm62_vm11, %v61_v26  }
  0x84   :  { %v80_v29 = vpop.permute.xlu1 %79  }
  0x85   :  { %83 = vst.msk [vmem:[#allocation0 + $0x8] sm:$0x1] %vm81_vm14, %v80_v29  }
  0x86   :  { %v74_v28 = vpop.permute.xlu0 %73  }
  0x87   :  { %76 = vst.msk [vmem:[#allocation0] sm:$0x1] %vm75_vm13, %v74_v28  }
  0x88   :  { %v93_v31 = vpop.permute.xlu1 %92  }
  0x89   :  { %96 = vst.msk [vmem:[#allocation0 + $0x8] sm:$0x1] %vm94_vm0, %v93_v31  }
  0x8a   :  { %v87_v30 = vpop.permute.xlu0 %86  }
  0x8b   :  { %89 = vst.msk [vmem:[#allocation0] sm:$0x1] %vm88_vm15, %v87_v30  }
  0x8c   :  { %v106_v33 = vpop.permute.xlu1 %105  }
  0x8d   :  { %109 = vst.msk [vmem:[#allocation0 + $0x8] sm:$0x1] %vm107_vm2, %v106_v33  }
  0x8e   :  { %v100_v32 = vpop.permute.xlu0 %99  }
  0x8f   :  { %102 = vst.msk [vmem:[#allocation0] sm:$0x1] %vm101_vm1, %v100_v32  }
  0x92   :  { %v113_v34 = vpop.permute.xlu0 %112  }
  0x93   :  { %116 = vst.msk [vmem:[#allocation0 + $0x10] sm:$0x1] %vm114_vm3, %v113_v34  }
  0x94   :  { %v124_v36 = vld [vmem:[#allocation0 + $0x8] sm:$0x1] }
  0x95   :  { %152 = vst [vmem:[%s258_s1 + $0x1] sm:$0x1] %v124_v36 }
  0x96   :  { %v120_v35 = vld [vmem:[#allocation0] sm:$0x1] }
  0x97   :  { %122 = vst [vmem:[%s258_s1] sm:$0x1] %v120_v35 }
  0x9a   :  { %v129_v37 = vld [vmem:[#allocation0 + $0x10] sm:$0x1] }
  0x9b   :  { %153 = vst [vmem:[%s258_s1 + $0x2] sm:$0x1] %v129_v37 }

// kernel: _lambda_.1
= control target key start
LH: loop header
LB: loop body
LE: loop exit
PB: predicated region body
PF: predicated region fallthrough
CT: control target
= control target key end

     0   :  { %s2666_s24 = smov 0   ;;  %s2999_s0 = inlined_call_operand.vmem [shape: bf16[2,8,342], index: 0, kind: input, shape index: {}]   ;;  %s3000_s1 = inlined_call_operand.vmem [shape: f32[2,8,288], index: 1, kind: input, shape index: {}]   ;;  %s3001_s2 = inlined_call_operand.vmem [shape: bf16[9,8,8], index: 2, kind: input, shape index: {}]   ;;  %s3002_s3 = inlined_call_operand.vmem [shape: bf16[9,8,8], index: 3, kind: input, shape index: {}]   ;;  %s3003_s4 = inlined_call_operand.vmem [shape: f32[8,1], index: 4, kind: input, shape index: {}]   ;;  %s3004_s5 = inlined_call_operand.vmem [shape: f32[8,1], index: 5, kind: input, shape index: {}]   ;;  %s3005_s6 = inlined_call_operand.vmem [shape: f32[1,288], index: 6, kind: input, shape index: {}]   ;;  %s3006_s7 = inlined_call_operand.vmem [shape: f32[2,8,288], index: 7, kind: output, shape index: {}]  }
   0x1 LB: > { %s2352_s25 = sadd.s32 4294967295, %s2612_s24   ;;  %p2356_p0 = scmp.ge.s32.totalorder %s2612_s24, 1  ;;  %s2612_s24 = sphi %s2666_s24, %s17_s24  }
   0x2   : > { %p247_p1 = scmp.lt.s32.totalorder %s2612_s24, 3 }
   0x4   : > { %p248_p2 = pnand %p2356_p0, %p247_p1 }
   0x5   : > { %p284_p3 = scmp.lt.s32.totalorder (!%p248_p2), %s2352_s25, 1  ;;  %v2614_v0 = vmov (!%p248_p2), 0.0   ;;  %vm2615_vm0 = vmmov (!%p248_p2), 0   ;;  %v2616_v1 = vmov (!%p248_p2), 0   ;;  %s2617_s30 = smov (!%p248_p2), 127   ;;  %v1259_v6 = vld [vmem:[%s3003_s4] sm:$0xff] (!%p248_p2) }
   0x6   : > { %251 = sbr.rel (%p248_p2) target bundleno = 964 (0x3c4), region = 48  ;;  %2471 = vmatprep.subr.bf16.mxu1 (!%p248_p2), %v2614_v0  ;;  %1291 = vst [vmem:[#allocation2] sm:$0xff] (!%p248_p2), %v2614_v0  ;;  %2473 = vmatprep.mubr.msk.bf16.mxu1 (!%p248_p2), %vm2615_vm0, %v2614_v0  ;;  %s2618_s8 = smov (!%p248_p2), 126   ;;  %vm326_vm1 = vcmask (!%p248_p2), 1043456   ;;  %v2360_v10 = vld [vmem:[%s3001_s2 + $0x4] sm:$0xf] (!%p248_p2) }
   0x7   : > { %368 = vmatprep.mubr.bf16.mxu0 (!%p248_p2), %v2616_v1  ;;  %2601 = vset.pattern.permute.xlu0 (!%p248_p2), %v2616_v1  ;;  %s2619_s9 = smov (!%p248_p2), 110   ;;  %s2620_s10 = smov (!%p248_p2), 109   ;;  %vm322_vm2 = vcmask (!%p248_p2), 64512   ;;  %vm319_vm3 = vcmask (!%p248_p2), 1039360   ;;  %vm518_vm4 = vcmask (!%p248_p2), 1031168   ;;  %vm625_vm5 = vcmask (!%p248_p2), 900096  }
   0x8   : > { %2602 = vset.pattern.permute.xlu1 (!%p248_p2), %v2616_v1  ;;  %s2621_s11 = smov (!%p248_p2), 108   ;;  %s2622_s12 = smov (!%p248_p2), 92   ;;  %v300_v20 = vld [vmem:[%s3001_s2] sm:$0xf] (!%p248_p2)  ;;  %v2370_v29 = vld [vmem:[%s3001_s2 + $0x8] sm:$0xf] (!%p248_p2) }
   0x9   : > { %s2623_s13 = smov (!%p248_p2), 91   ;;  %s2624_s14 = smov (!%p248_p2), 90   ;;  %vm732_vm6 = vcmask (!%p248_p2), 891904   ;;  %v2374_v37 = vld [vmem:[%s3001_s2 + $0xc] sm:$0xf] (!%p248_p2)  ;;  %vm839_vm7 = vcmask (!%p248_p2), 883712  }
   0xa   : > { %v2378_v45 = vld [vmem:[%s3001_s2 + $0x10] sm:$0xf] (!%p248_p2)  ;;  %vm946_vm8 = vcmask (!%p248_p2), 752640   ;;  %v2382_v53 = vld [vmem:[%s3001_s2 + $0x14] sm:$0xf] (!%p248_p2)  ;;  %vm1053_vm9 = vcmask (!%p248_p2), 744448  }
   0xb   : > { %v2386_v61 = vld [vmem:[%s3001_s2 + $0x18] sm:$0xf] (!%p248_p2)  ;;  %vm1160_vm10 = vcmask (!%p248_p2), 736256   ;;  %vm1293_vm11 = vcmask (!%p248_p2), 703488   ;;  %vm1310_vm12 = vcmask (!%p248_p2), 1047704   ;;  %vm1304_vm13 = vcmask (!%p248_p2), 154624  }
   0xc   : > { %1294 = vst.msk [vmem:[#allocation2 + $0x10] sm:$0xff] (!%p248_p2), %vm1293_vm11, %v2614_v0  ;;  %vm1313_vm14 = vcmask (!%p248_p2), 416768   ;;  %vm2283_vm15 = vcmask (!%p248_p2), 261120  }
   0xd   : > { %s3008_s25 = smov (!%p284_p3, %s2352_s25), 1 }
   0xe   : > { %s2579_s26 = smul.u32 12, %s3008_s25 }
  0x10   : > { %s288_s29 = scalar_lea.vmem %s2999_s0, %s2579_s26  ;;  %s2625_s26 = smov 19  }
  0x11   : > { %v2603_v2 = vld [vmem:[%s288_s29 + $0x8] ss:$0 sps:$4 sm:$0xff]   ;;  %v301_v3 = vld [vmem:[%s288_s29] sm:$0xff] }
  0x12   : > { %v2361_v4 = vcombine.low %v301_v3, %v301_v3  ;;  %317 = vrot.lane.b32.xlu1 %v2603_v2, %s2617_s30  ;;  %v2362_v5 = vcombine.high %v301_v3, %v301_v3  ;;  %v427_v11 = vsel %vm326_vm1, %v2603_v2, 0 }
  0x14   : > { %313 = vrot.lane.b32.xlu0 %v2361_v4, %s2617_s30  ;;  %v421_v18 = vsel %vm326_vm1, %v2361_v4, 0 }
  0x16   : > { %512 = vrot.lane.b32.xlu1 %v2361_v4, %s2618_s8 }
  0x18   : > { %315 = vrot.lane.b32.xlu0 %v2362_v5, %s2617_s30 }
  0x1a   : > { %516 = vrot.lane.b32.xlu1 %v2603_v2, %s2618_s8 }
  0x1c   : > { %514 = vrot.lane.b32.xlu0 %v2362_v5, %s2618_s8 }
  0x1e   : > { %621 = vrot.lane.b32.xlu1 %v2362_v5, %s2619_s9 }
  0x20   : > { %619 = vrot.lane.b32.xlu0 %v2361_v4, %s2619_s9 }
  0x22   : > { %726 = vrot.lane.b32.xlu1 %v2361_v4, %s2620_s10 }
  0x24   : > { %623 = vrot.lane.b32.xlu0 %v2603_v2, %s2619_s9 }
  0x26   : > { %730 = vrot.lane.b32.xlu1 %v2603_v2, %s2620_s10 }
  0x28   : > { %728 = vrot.lane.b32.xlu0 %v2362_v5, %s2620_s10 }
  0x2a   : > { %835 = vrot.lane.b32.xlu1 %v2362_v5, %s2621_s11 }
  0x2c   : > { %833 = vrot.lane.b32.xlu0 %v2361_v4, %s2621_s11 }
  0x2e   : > { %940 = vrot.lane.b32.xlu1 %v2361_v4, %s2622_s12 }
  0x30   : > { %837 = vrot.lane.b32.xlu0 %v2603_v2, %s2621_s11 }
  0x32   : > { %944 = vrot.lane.b32.xlu1 %v2603_v2, %s2622_s12 }
  0x34   : > { %942 = vrot.lane.b32.xlu0 %v2362_v5, %s2622_s12 }
  0x36   : > { %1049 = vrot.lane.b32.xlu1 %v2362_v5, %s2623_s13 }
  0x38   : > { %1047 = vrot.lane.b32.xlu0 %v2361_v4, %s2623_s13 }
  0x3a   : > { %1154 = vrot.lane.b32.xlu1 %v2361_v4, %s2624_s14 }
  0x3c   : > { %1051 = vrot.lane.b32.xlu0 %v2603_v2, %s2623_s13 }
  0x3e   : > { %1158 = vrot.lane.b32.xlu1 %v2603_v2, %s2624_s14 }
  0x40   : > { %1156 = vrot.lane.b32.xlu0 %v2362_v5, %s2624_s14 }
  0x44   : > { %1262 = vperm.xlu0 %2601, %v1259_v6   ;;  %v2390_v6 = vld [vmem:[%s3001_s2 + $0x1c] sm:$0xf] }
  0x84   : > { %v318_v7 = vpop.permute.xlu1 %317 }
  0x85   : > { %v334_v9 = vsel %vm326_vm1, %v318_v7, 0 }
  0x86   : > { %v314_v8 = vpop.permute.xlu0 %313  ;;  %2472 = vmatpush3.bf16.msra.mxu1 %v334_v9 }
  0x87   : > { %2477 = vmatprep.subr.bf16.mxu1 %v2614_v0 }
  0x88   : > { %v513_v12 = vpop.permute.xlu1 %512 }
  0x89   : > { %2474 = vmatmul.mubr.msk.bf16.vlgmr.msra.gmra.mrb[0].mxu1 %vm322_vm2, %v2360_v10 }
  0x8a   : > { %v316_v13 = vpop.permute.xlu0 %315  ;;  %2478 = vmatpush3.bf16.msra.mxu1 %v427_v11  ;;  %2479 = vmatprep.mubr.msk.bf16.mxu1 %vm2615_vm0, %v2614_v0  ;;  %v2394_v11 = vld [vmem:[%s3001_s2 + $0x20] sm:$0xf] }
  0x8b   : > { %v321_v14 = vsel %vm319_vm3, %v316_v13, %v318_v7  ;;  %v320_v15 = vsel %vm319_vm3, %v314_v8, %v316_v13  ;;  %2483 = vmatprep.subr.bf16.mxu1 %v2614_v0 }
  0x8c   : > { %2364 = vmatprep.subr.msk.bf16.mxu0 %vm326_vm1, %v321_v14  ;;  %v328_v16 = vsel %vm326_vm1, %v320_v15, 0  ;;  %v517_v17 = vpop.permute.xlu1 %516 }
  0x8d   : > { %337 = vmatpush1.bf16.msra.mxu0 %v328_v16  ;;  %v531_v22 = vsel %vm326_vm1, %v517_v17, 0 }
  0x8e   : > { %2367 = vmatprep.subr.msk.bf16.mxu0 %vm326_vm1, %v2362_v5  ;;  %v515_v19 = vpop.permute.xlu0 %514 }
  0x8f   : > { %v520_v21 = vsel %vm518_vm4, %v515_v19, %v517_v17  ;;  %v519_v25 = vsel %vm518_vm4, %v513_v12, %v515_v19 }
  0x90   : > { %2365 = vmatmul.mubr.msk.bf16.vlgmr.msra.gmra.mrb[0].mxu0 %vm322_vm2, %v2360_v10  ;;  %v622_v23 = vpop.permute.xlu1 %621  ;;  %v525_v26 = vsel %vm326_vm1, %v519_v25, 0 }
  0x91   : > { %430 = vmatpush1.bf16.msra.mxu0 %v421_v18  ;;  %461 = vmatprep.mubr.bf16.mxu0 %v2616_v1 }
  0x92   : > { %2480 = vmatmul.mubr.msk.bf16.vlgmr.msra.gmra.mrb[4].mxu1 %vm322_vm2, %v300_v20  ;;  %2371 = vmatprep.subr.msk.bf16.mxu0 %vm326_vm1, %v520_v21  ;;  %v620_v24 = vpop.permute.xlu0 %619 }
  0x93   : > { %2484 = vmatpush3.bf16.msra.mxu1 %v531_v22  ;;  %2485 = vmatprep.mubr.msk.bf16.mxu1 %vm2615_vm0, %v2614_v0  ;;  %v626_v33 = vsel %vm625_vm5, %v620_v24, %v622_v23 }
  0x94   : > { %2489 = vmatprep.subr.bf16.mxu1 %v2614_v0  ;;  %v727_v28 = vpop.permute.xlu1 %726  ;;  %v632_v35 = vsel %vm326_vm1, %v626_v33, 0 }
  0x96   : > { %v624_v27 = vpop.permute.xlu0 %623 }
  0x97   : > { %v627_v30 = vsel %vm625_vm5, %v622_v23, %v624_v27  ;;  %v638_v31 = vsel %vm326_vm1, %v624_v27, 0 }
  0x98   : > { %2368 = vmatmul.mubr.msk.bf16.vlgmr.msra.gmra.mrb[4].mxu0 %vm322_vm2, %v300_v20  ;;  %v731_v34 = vpop.permute.xlu1 %730 }
  0x99   : > { %534 = vmatpush1.bf16.msra.mxu0 %v525_v26  ;;  %565 = vmatprep.mubr.bf16.mxu0 %v2616_v1  ;;  %v745_v39 = vsel %vm326_vm1, %v731_v34, 0 }
  0x9a   : > { %2486 = vmatmul.mubr.msk.bf16.vlgmr.msra.gmra.mrb[8].mxu1 %vm322_vm2, %v2370_v29  ;;  %2375 = vmatprep.subr.msk.bf16.mxu0 %vm326_vm1, %v627_v30  ;;  %v729_v32 = vpop.permute.xlu0 %728 }
  0x9b   : > { %2490 = vmatpush3.bf16.msra.mxu1 %v638_v31  ;;  %2491 = vmatprep.mubr.msk.bf16.mxu1 %vm2615_vm0, %v2614_v0  ;;  %v734_v38 = vsel %vm732_vm6, %v729_v32, %v731_v34  ;;  %v733_v41 = vsel %vm732_vm6, %v727_v28, %v729_v32 }
  0x9c   : > { %2495 = vmatprep.subr.bf16.mxu1 %v2614_v0  ;;  %v836_v40 = vpop.permute.xlu1 %835  ;;  %v739_v43 = vsel %vm326_vm1, %v733_v41, 0 }
  0x9e   : > { %v834_v36 = vpop.permute.xlu0 %833 }
  0x9f   : > { %v840_v49 = vsel %vm839_vm7, %v834_v36, %v836_v40 }
  0xa0   : > { %2372 = vmatmul.mubr.msk.bf16.vlgmr.msra.gmra.mrb[8].mxu0 %vm322_vm2, %v2370_v29  ;;  %v941_v44 = vpop.permute.xlu1 %940  ;;  %v846_v51 = vsel %vm326_vm1, %v840_v49, 0 }
  0xa1   : > { %641 = vmatpush1.bf16.msra.mxu0 %v632_v35  ;;  %672 = vmatprep.mubr.bf16.mxu0 %v2616_v1 }
  0xa2   : > { %2492 = vmatmul.mubr.msk.bf16.vlgmr.msra.gmra.mrb[12].mxu1 %vm322_vm2, %v2374_v37  ;;  %2379 = vmatprep.subr.msk.bf16.mxu0 %vm326_vm1, %v734_v38  ;;  %v838_v42 = vpop.permute.xlu0 %837 }
  0xa3   : > { %2496 = vmatpush3.bf16.msra.mxu1 %v745_v39  ;;  %2497 = vmatprep.mubr.msk.bf16.mxu1 %vm2615_vm0, %v2614_v0  ;;  %v841_v46 = vsel %vm839_vm7, %v836_v40, %v838_v42  ;;  %v852_v47 = vsel %vm326_vm1, %v838_v42, 0 }
  0xa4   : > { %2501 = vmatprep.subr.bf16.mxu1 %v2614_v0  ;;  %v945_v50 = vpop.permute.xlu1 %944 }
  0xa5   : > { %v959_v55 = vsel %vm326_vm1, %v945_v50, 0 }
  0xa6   : > { %v943_v48 = vpop.permute.xlu0 %942 }
  0xa7   : > { %v948_v54 = vsel %vm946_vm8, %v943_v48, %v945_v50  ;;  %v947_v57 = vsel %vm946_vm8, %v941_v44, %v943_v48 }
  0xa8   : > { %2376 = vmatmul.mubr.msk.bf16.vlgmr.msra.gmra.mrb[12].mxu0 %vm322_vm2, %v2374_v37  ;;  %v1050_v56 = vpop.permute.xlu1 %1049  ;;  %v953_v59 = vsel %vm326_vm1, %v947_v57, 0 }
  0xa9   : > { %748 = vmatpush1.bf16.msra.mxu0 %v739_v43  ;;  %779 = vmatprep.mubr.bf16.mxu0 %v2616_v1 }
  0xaa   : > { %2498 = vmatmul.mubr.msk.bf16.vlgmr.msra.gmra.mrb[16].mxu1 %vm322_vm2, %v2378_v45  ;;  %2383 = vmatprep.subr.msk.bf16.mxu0 %vm326_vm1, %v841_v46  ;;  %v1048_v52 = vpop.permute.xlu0 %1047 }
  0xab   : > { %2502 = vmatpush3.bf16.msra.mxu1 %v852_v47  ;;  %2503 = vmatprep.mubr.msk.bf16.mxu1 %vm2615_vm0, %v2614_v0  ;;  %v1054_v2 = vsel %vm1053_vm9, %v1048_v52, %v1050_v56 }
  0xac   : > { %2507 = vmatprep.subr.bf16.mxu1 %v2614_v0  ;;  %v1155_v60 = vpop.permute.xlu1 %1154  ;;  %v1060_v5 = vsel %vm326_vm1, %v1054_v2, 0 }
  0xae   : > { %v1052_v58 = vpop.permute.xlu0 %1051 }
  0xaf   : > { %v1055_v62 = vsel %vm1053_vm9, %v1050_v56, %v1052_v58  ;;  %v1066_v63 = vsel %vm326_vm1, %v1052_v58, 0 }
  0xb0   : > { %2380 = vmatmul.mubr.msk.bf16.vlgmr.msra.gmra.mrb[16].mxu0 %vm322_vm2, %v2378_v45  ;;  %v1159_v3 = vpop.permute.xlu1 %1158 }
  0xb1   : > { %855 = vmatpush1.bf16.msra.mxu0 %v846_v51  ;;  %886 = vmatprep.mubr.bf16.mxu0 %v2616_v1  ;;  %v1173_v8 = vsel %vm326_vm1, %v1159_v3, 0 }
  0xb2   : > { %2504 = vmatmul.mubr.msk.bf16.vlgmr.msra.gmra.mrb[20].mxu1 %vm322_vm2, %v2382_v53  ;;  %2387 = vmatprep.subr.msk.bf16.mxu0 %vm326_vm1, %v948_v54  ;;  %v1157_v4 = vpop.permute.xlu0 %1156 }
  0xb3   : > { %2508 = vmatpush3.bf16.msra.mxu1 %v959_v55  ;;  %2509 = vmatprep.mubr.msk.bf16.mxu1 %vm2615_vm0, %v2614_v0  ;;  %v1162_v7 = vsel %vm1160_vm10, %v1157_v4, %v1159_v3  ;;  %v1161_v9 = vsel %vm1160_vm10, %v1155_v60, %v1157_v4 }
  0xb4   : > { %2513 = vmatprep.subr.bf16.mxu1 %v2614_v0  ;;  %v1167_v10 = vsel %vm326_vm1, %v1161_v9, 0 }
  0xb8   : > { %2384 = vmatmul.mubr.msk.bf16.vlgmr.msra.gmra.mrb[20].mxu0 %vm322_vm2, %v2382_v53 }
  0xb9   : > { %962 = vmatpush1.bf16.msra.mxu0 %v953_v59  ;;  %993 = vmatprep.mubr.bf16.mxu0 %v2616_v1 }
  0xba   : > { %2510 = vmatmul.mubr.msk.bf16.vlgmr.msra.gmra.mrb[24].mxu1 %vm322_vm2, %v2386_v61  ;;  %2391 = vmatprep.subr.msk.bf16.mxu0 %vm326_vm1, %v1055_v62 }
  0xbb   : > { %2514 = vmatpush3.bf16.msra.mxu1 %v1066_v63  ;;  %2515 = vmatprep.mubr.msk.bf16.mxu1 %vm2615_vm0, %v2614_v0 }
  0xbc   : > { %2519 = vmatprep.subr.bf16.mxu1 %v2614_v0 }
  0xc0   : > { %2388 = vmatmul.mubr.msk.bf16.vlgmr.msra.gmra.mrb[24].mxu0 %vm322_vm2, %v2386_v61 }
  0xc1   : > { %1069 = vmatpush1.bf16.msra.mxu0 %v1060_v5  ;;  %1100 = vmatprep.mubr.bf16.mxu0 %v2616_v1 }
  0xc2   : > { %2516 = vmatmul.mubr.msk.bf16.vlgmr.msra.gmra.mrb[28].mxu1 %vm322_vm2, %v2390_v6  ;;  %2395 = vmatprep.subr.msk.bf16.mxu0 %vm326_vm1, %v1162_v7 }
  0xc3   : > { %2520 = vmatpush3.bf16.msra.mxu1 %v1173_v8  ;;  %2521 = vmatprep.mubr.msk.bf16.mxu1 %vm2615_vm0, %v2614_v0 }
  0xc4   : > { %2525 = vmatprep.subr.bf16.mxu1 %v2614_v0 }
  0xc8   : > { %2392 = vmatmul.mubr.msk.bf16.vlgmr.msra.gmra.mrb[28].mxu0 %vm322_vm2, %v2390_v6 }
  0xc9   : > { %1176 = vmatpush1.bf16.msra.mxu0 %v1167_v10  ;;  %1207 = vmatprep.mubr.bf16.mxu0 %v2616_v1 }
  0xca   : > { %2522 = vmatmul.mubr.msk.bf16.vlgmr.msra.gmra.mrb[32].mxu1 %vm322_vm2, %v2394_v11 }
  0xcb   : > { %2527 = vmatprep.mubr.msk.bf16.mxu1 %vm2615_vm0, %v2614_v0 }
  0xd0   : > { %2396 = vmatmul.mubr.msk.bf16.vlgmr.msra.gmra.mrb[32].mxu0 %vm322_vm2, %v2394_v11 }
  0xd1   : > { %1379 = vmatprep.mubr.bf16.mxu0 %v2616_v1 }
 0x15c   : > { %v411_v12 = vpop.f32.mrb[0].mxu1 }
 0x15d   : > { %v2475_v13 = vpop.f32.mrb[1].mxu1 }
 0x15e   : > { %v414_v14 = vpop.f32.mrb[2].mxu1 }
 0x15f   : > { %v2476_v15 = vpop.f32.mrb[3].mxu1 }
 0x163   : > { %v370_v16 = vpop.f32.mrb[0].mxu0 }
 0x164   : > { %v372_v17 = vpop.f32.mrb[1].mxu0 }
 0x165   : > { %v374_v18 = vpop.f32.mrb[2].mxu0  ;;  %v504_v19 = vpop.f32.mrb[4].mxu1 }
 0x166   : > { %v375_v20 = vpop.f32.mrb[3].mxu0  ;;  %v505_v21 = vadd.f32 %v504_v19, %v411_v12  ;;  %v2481_v22 = vpop.f32.mrb[5].mxu1 }
 0x167   : > { %v507_v23 = vpop.f32.mrb[6].mxu1 }
 0x168   : > { %v2482_v24 = vpop.f32.mrb[7].mxu1 }
 0x16b   : > { %v463_v25 = vpop.f32.mrb[4].mxu0 }
 0x16c   : > { %v464_v26 = vadd.f32 %v463_v25, %v370_v16  ;;  %v465_v27 = vpop.f32.mrb[5].mxu0 }
 0x16d   : > { %v466_v28 = vadd.f32 %v465_v27, %v372_v17  ;;  %v467_v29 = vpop.f32.mrb[6].mxu0  ;;  %v608_v30 = vpop.f32.mrb[8].mxu1 }
 0x16e   : > { %v468_v31 = vpop.f32.mrb[7].mxu0  ;;  %v616_v32 = vadd.f32 %v608_v30, %v505_v21  ;;  %v2487_v33 = vpop.f32.mrb[9].mxu1  ;;  %v1273_v21 = vlaneseq }
 0x16f   : > { %v611_v34 = vpop.f32.mrb[10].mxu1 }
 0x170   : > { %v2488_v35 = vpop.f32.mrb[11].mxu1  ;;  %v1274_v30 = vshrl.u32 %v1273_v21, 7  ;;  %v1263_v34 = vpop.permute.xlu0 %1262 }
 0x172   : > { %v1283_v35 = vsub.s32 2, %v1274_v30 }
 0x173   : > { %v567_v36 = vpop.f32.mrb[8].mxu0 }
 0x174   : > { %v614_v37 = vadd.f32 %v567_v36, %v464_v26  ;;  %v569_v38 = vpop.f32.mrb[9].mxu0 }
 0x175   : > { %v615_v39 = vadd.f32 %v569_v38, %v466_v28  ;;  %v571_v40 = vpop.f32.mrb[10].mxu0  ;;  %v715_v41 = vpop.f32.mrb[12].mxu1 }
 0x176   : > { %v572_v42 = vpop.f32.mrb[11].mxu0  ;;  %v723_v43 = vadd.f32 %v715_v41, %v616_v32  ;;  %v2493_v44 = vpop.f32.mrb[13].mxu1 }
 0x177   : > { %v718_v45 = vpop.f32.mrb[14].mxu1 }
 0x178   : > { %v2494_v46 = vpop.f32.mrb[15].mxu1 }
 0x17b   : > { %v674_v47 = vpop.f32.mrb[12].mxu0 }
 0x17c   : > { %v721_v48 = vadd.f32 %v674_v47, %v614_v37  ;;  %v676_v49 = vpop.f32.mrb[13].mxu0 }
 0x17d   : > { %v722_v50 = vadd.f32 %v676_v49, %v615_v39  ;;  %v678_v51 = vpop.f32.mrb[14].mxu0  ;;  %v822_v52 = vpop.f32.mrb[16].mxu1  ;;  %v1271_v39 = vld [vmem:[%s3005_s6] sm:$0x7] }
 0x17e   : > { %v679_v53 = vpop.f32.mrb[15].mxu0  ;;  %v830_v54 = vadd.f32 %v822_v52, %v723_v43  ;;  %v2499_v55 = vpop.f32.mrb[17].mxu1  ;;  %v1284_v46 = vrot.slane %v1271_v39, %v1283_v35 }
 0x17f   : > { %v825_v56 = vpop.f32.mrb[18].mxu1 }
 0x180   : > { %v2500_v57 = vpop.f32.mrb[19].mxu1 }
 0x183   : > { %v781_v58 = vpop.f32.mrb[16].mxu0 }
 0x184   : > { %v828_v59 = vadd.f32 %v781_v58, %v721_v48  ;;  %v783_v60 = vpop.f32.mrb[17].mxu0  ;;  %v1275_v48 = vsub.s32 0, %v1274_v30  ;;  %v1279_v58 = vsub.s32 1, %v1274_v30  ;;  %v1321_v30 = vld [vmem:[%s3002_s3] sm:$0xf] }
 0x185   : > { %v829_v61 = vadd.f32 %v783_v60, %v722_v50  ;;  %v785_v62 = vpop.f32.mrb[18].mxu0  ;;  %v929_v63 = vpop.f32.mrb[20].mxu1 }
 0x186   : > { %v786_v2 = vpop.f32.mrb[19].mxu0  ;;  %v937_v3 = vadd.f32 %v929_v63, %v830_v54  ;;  %v2505_v4 = vpop.f32.mrb[21].mxu1  ;;  %v1276_v57 = vrot.slane %v1271_v39, %v1275_v48  ;;  %v1280_v63 = vrot.slane %v1271_v39, %v1279_v58  ;;  %v2405_v39 = vld [vmem:[%s3002_s3 + $0x8] sm:$0xf] }
 0x187   : > { %v932_v5 = vpop.f32.mrb[22].mxu1 }
 0x188   : > { %v2506_v6 = vpop.f32.mrb[23].mxu1 }
 0x18b   : > { %v888_v7 = vpop.f32.mrb[20].mxu0 }
 0x18c   : > { %v935_v8 = vadd.f32 %v888_v7, %v828_v59  ;;  %v890_v9 = vpop.f32.mrb[21].mxu0 }
 0x18d   : > { %v936_v10 = vadd.f32 %v890_v9, %v829_v61  ;;  %v892_v11 = vpop.f32.mrb[22].mxu0  ;;  %v1036_v12 = vpop.f32.mrb[24].mxu1 }
 0x18e   : > { %v893_v13 = vpop.f32.mrb[23].mxu0  ;;  %v1044_v14 = vadd.f32 %v1036_v12, %v937_v3  ;;  %v2511_v15 = vpop.f32.mrb[25].mxu1 }
 0x18f   : > { %v1039_v16 = vpop.f32.mrb[26].mxu1  ;;  %v2266_v13 = vld [vmem:[%s3004_s5] sm:$0xff] }
 0x190   : > { %v2512_v17 = vpop.f32.mrb[27].mxu1 }
 0x193   : > { %v995_v18 = vpop.f32.mrb[24].mxu0 }
 0x194   : > { %v1042_v19 = vadd.f32 %v995_v18, %v935_v8  ;;  %v997_v20 = vpop.f32.mrb[25].mxu0 }
 0x195   : > { %v1043_v22 = vadd.f32 %v997_v20, %v936_v10  ;;  %v999_v23 = vpop.f32.mrb[26].mxu0  ;;  %v1143_v24 = vpop.f32.mrb[28].mxu1 }
 0x196   : > { %v1000_v25 = vpop.f32.mrb[27].mxu0  ;;  %v1151_v26 = vadd.f32 %v1143_v24, %v1044_v14  ;;  %v2517_v27 = vpop.f32.mrb[29].mxu1  ;;  %v2398_v23 = vld [vmem:[%s3002_s3 + $0x4] sm:$0xf] }
 0x197   : > { %v1146_v28 = vpop.f32.mrb[30].mxu1 }
 0x198   : > { %v2518_v29 = vpop.f32.mrb[31].mxu1 }
 0x19b   : > { %v1102_v31 = vpop.f32.mrb[28].mxu0 }
 0x19c   : > { %v1149_v32 = vadd.f32 %v1102_v31, %v1042_v19  ;;  %v1104_v33 = vpop.f32.mrb[29].mxu0 }
 0x19d   : > { %v1150_v36 = vadd.f32 %v1104_v33, %v1043_v22  ;;  %v1106_v37 = vpop.f32.mrb[30].mxu0  ;;  %v1250_v38 = vpop.f32.mrb[32].mxu1 }
 0x19e   : > { %v1107_v40 = vpop.f32.mrb[31].mxu0  ;;  %v1258_v41 = vadd.f32 %v1250_v38, %v1151_v26  ;;  %v2523_v42 = vpop.f32.mrb[33].mxu1 }
 0x19f   : > { %v1253_v43 = vpop.f32.mrb[34].mxu1 }
 0x1a0   : > { %v1267_v44 = vadd.f32 %v1263_v34, %v1258_v41  ;;  %v2524_v45 = vpop.f32.mrb[35].mxu1 }
 0x1a2   : > { %v1270_v47 = vmax.f32 %v1267_v44, 0.0 }
 0x1a3   : > { %v1209_v49 = vpop.f32.mrb[32].mxu0 }
 0x1a4   : > { %v1256_v50 = vadd.f32 %v1209_v49, %v1149_v32  ;;  %v1211_v51 = vpop.f32.mrb[33].mxu0  ;;  %v1290_v52 = vmul.f32 %v1284_v46, %v1270_v47  ;;  %v2409_v47 = vld [vmem:[%s3002_s3 + $0xc] sm:$0xf] }
 0x1a5   : > { %v1257_v53 = vadd.f32 %v1211_v51, %v1150_v36  ;;  %v1213_v54 = vpop.f32.mrb[34].mxu0 }
 0x1a6   : > { %v1265_v55 = vadd.f32 %v1263_v34, %v1256_v50  ;;  %v1214_v56 = vpop.f32.mrb[35].mxu0  ;;  %1302 = vrot.lane.b32.xlu0 %v1290_v52, %s2625_s26  ;;  %v2413_v54 = vld [vmem:[%s3002_s3 + $0x10] sm:$0xf] }
 0x1a7   : > { %v1266_v59 = vadd.f32 %v1263_v34, %v1257_v53 }
 0x1a8   : > { %v1268_v60 = vmax.f32 %v1265_v55, 0.0 }
 0x1a9   : > { %v1269_v61 = vmax.f32 %v1266_v59, 0.0 }
 0x1aa   : > { %v1288_v62 = vmul.f32 %v1276_v57, %v1268_v60 }
 0x1ab   : > { %v1289_v2 = vmul.f32 %v1280_v63, %v1269_v61 }
 0x1ac   : > { %1298 = vrot.lane.b32.xlu1 %v1288_v62, %s2625_s26  ;;  %v2417_v62 = vld [vmem:[%s3002_s3 + $0x14] sm:$0xf] }
 0x1b0   : > { %1300 = vrot.lane.b32.xlu1 %v1289_v2, %s2625_s26  ;;  %s2580_s26 = smul.u32 24, %s3008_s25 }
 0x218   : > { %v1303_v4 = vpop.permute.xlu0 %1302 }
 0x21e   : > { %v1299_v3 = vpop.permute.xlu1 %1298 }
 0x21f   : > { %1311 = vst.msk [vmem:[#allocation2] sm:$0xff] %vm1310_vm12, %v1299_v3 }
 0x222   : > { %v1301_v5 = vpop.permute.xlu1 %1300 }
 0x223   : > { %v1305_v6 = vsel %vm1304_vm13, %v1299_v3, %v1301_v5  ;;  %v1306_v7 = vsel %vm1304_vm13, %v1301_v5, %v1303_v4 }
 0x224   : > { %1314 = vst.msk [vmem:[#allocation2 + $0x10] sm:$0xff] %vm1313_vm14, %v1306_v7  ;;  %v1319_v8 = vpack.c.bf16 %v1305_v6, %v1305_v6  ;;  %v2421_v7 = vld [vmem:[%s3002_s3 + $0x18] sm:$0xf] }
 0x226   : > { %v1315_v9 = vld [vmem:[#allocation2] sm:$0xff]  ;;  %1329 = vrot.lane.b32.xlu0 %v1319_v8, %s2617_s30 }
 0x227   : > { %v1318_v10 = vpack.c.bf16 %v1315_v9, %v1315_v9 }
 0x229   : > { %1327 = vrot.lane.b32.xlu1 %v1318_v10, %s2617_s30  ;;  %v1432_v26 = vsel %vm326_vm1, %v1318_v10, 0 }
 0x22a   : > { %1523 = vrot.lane.b32.xlu0 %v1318_v10, %s2618_s8 }
 0x22b   : > { %v1317_v11 = vld [vmem:[#allocation2 + $0x10] sm:$0xff] }
 0x22c   : > { %v1320_v12 = vpack.c.bf16 %v1317_v11, %v1317_v11 }
 0x22e   : > { %1331 = vrot.lane.b32.xlu1 %v1320_v12, %s2617_s30  ;;  %1527 = vrot.lane.b32.xlu0 %v1320_v12, %s2618_s8  ;;  %v1438_v25 = vsel %vm326_vm1, %v1320_v12, 0 }
 0x232   : > { %1525 = vrot.lane.b32.xlu1 %v1319_v8, %s2618_s8  ;;  %1631 = vrot.lane.b32.xlu0 %v1319_v8, %s2619_s9 }
 0x236   : > { %1629 = vrot.lane.b32.xlu1 %v1318_v10, %s2619_s9  ;;  %1735 = vrot.lane.b32.xlu0 %v1318_v10, %s2620_s10 }
 0x23a   : > { %1633 = vrot.lane.b32.xlu1 %v1320_v12, %s2619_s9  ;;  %1739 = vrot.lane.b32.xlu0 %v1320_v12, %s2620_s10  ;;  %s293_s9 = scalar_lea.vmem %s3000_s1, %s2580_s26 }
 0x23e   : > { %1737 = vrot.lane.b32.xlu1 %v1319_v8, %s2620_s10  ;;  %1843 = vrot.lane.b32.xlu0 %v1319_v8, %s2621_s11 }
 0x242   : > { %1841 = vrot.lane.b32.xlu1 %v1318_v10, %s2621_s11  ;;  %1947 = vrot.lane.b32.xlu0 %v1318_v10, %s2622_s12 }
 0x246   : > { %1845 = vrot.lane.b32.xlu1 %v1320_v12, %s2621_s11  ;;  %1951 = vrot.lane.b32.xlu0 %v1320_v12, %s2622_s12  ;;  %s298_s11 = scalar_lea.vmem %s3006_s7, %s2580_s26 }
 0x24a   : > { %1949 = vrot.lane.b32.xlu1 %v1319_v8, %s2622_s12  ;;  %2055 = vrot.lane.b32.xlu0 %v1319_v8, %s2623_s13 }
 0x24e   : > { %2053 = vrot.lane.b32.xlu1 %v1318_v10, %s2623_s13  ;;  %2159 = vrot.lane.b32.xlu0 %v1318_v10, %s2624_s14 }
 0x252   : > { %2057 = vrot.lane.b32.xlu1 %v1320_v12, %s2623_s13  ;;  %2163 = vrot.lane.b32.xlu0 %v1320_v12, %s2624_s14 }
 0x256   : > { %2161 = vrot.lane.b32.xlu1 %v1319_v8, %s2624_s14 }
 0x25a   : > { %2269 = vperm.xlu1 %2602, %v2266_v13  }
 0x298   : > { %v1330_v14 = vpop.permute.xlu0 %1329 }
 0x29b   : > { %v1328_v15 = vpop.permute.xlu1 %1327 }
 0x29c   : > { %v1524_v16 = vpop.permute.xlu0 %1523  ;;  %v1333_v17 = vsel %vm319_vm3, %v1328_v15, %v1330_v14 }
 0x29d   : > { %v1339_v22 = vsel %vm326_vm1, %v1333_v17, 0 }
 0x2a0   : > { %v1332_v18 = vpop.permute.xlu1 %1331  ;;  %v1528_v19 = vpop.permute.xlu0 %1527 }
 0x2a1   : > { %v1334_v20 = vsel %vm319_vm3, %v1330_v14, %v1332_v18  ;;  %v1345_v21 = vsel %vm326_vm1, %v1332_v18, 0  ;;  %v1541_v34 = vsel %vm326_vm1, %v1528_v19, 0  ;;  %v2425_v14 = vld [vmem:[%s3002_s3 + $0x1c] sm:$0xf]  ;;  %v2429_v18 = vld [vmem:[%s3002_s3 + $0x20] sm:$0xf] }
 0x2a2   : > { %2399 = vmatprep.subr.msk.bf16.mxu0 %vm326_vm1, %v1334_v20  ;;  %2526 = vmatpush3.bf16.msra.mxu1 %v1345_v21 }
 0x2a3   : > { %1348 = vmatpush1.bf16.msra.mxu0 %v1339_v22  ;;  %2531 = vmatprep.subr.bf16.mxu1 %v2614_v0 }
 0x2a4   : > { %2402 = vmatprep.subr.msk.bf16.mxu0 %vm326_vm1, %v1319_v8  ;;  %v1526_v24 = vpop.permute.xlu1 %1525  ;;  %v1632_v27 = vpop.permute.xlu0 %1631 }
 0x2a5   : > { %2528 = vmatmul.mubr.msk.bf16.vlgmr.msra.gmra.mrb[36].mxu1 %vm322_vm2, %v2398_v23  ;;  %v1530_v28 = vsel %vm518_vm4, %v1526_v24, %v1528_v19  ;;  %v1529_v31 = vsel %vm518_vm4, %v1524_v16, %v1526_v24 }
 0x2a6   : > { %2400 = vmatmul.mubr.msk.bf16.vlgmr.msra.gmra.mrb[36].mxu0 %vm322_vm2, %v2398_v23  ;;  %2532 = vmatpush3.bf16.msra.mxu1 %v1438_v25  ;;  %v1535_v36 = vsel %vm326_vm1, %v1529_v31, 0 }
 0x2a7   : > { %1441 = vmatpush1.bf16.msra.mxu0 %v1432_v26  ;;  %2533 = vmatprep.mubr.msk.bf16.mxu1 %vm2615_vm0, %v2614_v0 }
 0x2a8   : > { %v1630_v29 = vpop.permute.xlu1 %1629  ;;  %2406 = vmatprep.subr.msk.bf16.mxu0 %vm326_vm1, %v1530_v28  ;;  %2537 = vmatprep.subr.bf16.mxu1 %v2614_v0  ;;  %v1736_v33 = vpop.permute.xlu0 %1735 }
 0x2a9   : > { %1472 = vmatprep.mubr.bf16.mxu0 %v2616_v1  ;;  %v1635_v40 = vsel %vm625_vm5, %v1630_v29, %v1632_v27 }
 0x2aa   : > { %v1641_v43 = vsel %vm326_vm1, %v1635_v40, 0 }
 0x2ac   : > { %v1634_v32 = vpop.permute.xlu1 %1633  ;;  %v1740_v38 = vpop.permute.xlu0 %1739 }
 0x2ad   : > { %v1636_v35 = vsel %vm625_vm5, %v1632_v27, %v1634_v32  ;;  %2534 = vmatmul.mubr.msk.bf16.vlgmr.msra.gmra.mrb[40].mxu1 %vm322_vm2, %v1321_v30  ;;  %v1647_v42 = vsel %vm326_vm1, %v1634_v32, 0  ;;  %v1753_v49 = vsel %vm326_vm1, %v1740_v38, 0 }
 0x2ae   : > { %2538 = vmatpush3.bf16.msra.mxu1 %v1541_v34  ;;  %2403 = vmatmul.mubr.msk.bf16.vlgmr.msra.gmra.mrb[40].mxu0 %vm322_vm2, %v1321_v30 }
 0x2af   : > { %1544 = vmatpush1.bf16.msra.mxu0 %v1535_v36  ;;  %2539 = vmatprep.mubr.msk.bf16.mxu1 %vm2615_vm0, %v2614_v0 }
 0x2b0   : > { %2410 = vmatprep.subr.msk.bf16.mxu0 %vm326_vm1, %v1636_v35  ;;  %v1738_v37 = vpop.permute.xlu1 %1737  ;;  %2543 = vmatprep.subr.bf16.mxu1 %v2614_v0  ;;  %v1844_v45 = vpop.permute.xlu0 %1843 }
 0x2b1   : > { %1575 = vmatprep.mubr.bf16.mxu0 %v2616_v1  ;;  %v1742_v44 = vsel %vm732_vm6, %v1738_v37, %v1740_v38  ;;  %v1741_v48 = vsel %vm732_vm6, %v1736_v33, %v1738_v37 }
 0x2b2   : > { %v1747_v50 = vsel %vm326_vm1, %v1741_v48, 0 }
 0x2b4   : > { %v1842_v41 = vpop.permute.xlu1 %1841  ;;  %v1948_v51 = vpop.permute.xlu0 %1947 }
 0x2b5   : > { %2540 = vmatmul.mubr.msk.bf16.vlgmr.msra.gmra.mrb[44].mxu1 %vm322_vm2, %v2405_v39  ;;  %v1847_v55 = vsel %vm839_vm7, %v1842_v41, %v1844_v45 }
 0x2b6   : > { %2544 = vmatpush3.bf16.msra.mxu1 %v1647_v42  ;;  %2407 = vmatmul.mubr.msk.bf16.vlgmr.msra.gmra.mrb[44].mxu0 %vm322_vm2, %v2405_v39  ;;  %v1853_v58 = vsel %vm326_vm1, %v1847_v55, 0 }
 0x2b7   : > { %1650 = vmatpush1.bf16.msra.mxu0 %v1641_v43  ;;  %2545 = vmatprep.mubr.msk.bf16.mxu1 %vm2615_vm0, %v2614_v0 }
 0x2b8   : > { %2414 = vmatprep.subr.msk.bf16.mxu0 %vm326_vm1, %v1742_v44  ;;  %2549 = vmatprep.subr.bf16.mxu1 %v2614_v0  ;;  %v1846_v46 = vpop.permute.xlu1 %1845  ;;  %v1952_v56 = vpop.permute.xlu0 %1951 }
 0x2b9   : > { %1681 = vmatprep.mubr.bf16.mxu0 %v2616_v1  ;;  %v1848_v52 = vsel %vm839_vm7, %v1844_v45, %v1846_v46  ;;  %v1859_v57 = vsel %vm326_vm1, %v1846_v46, 0  ;;  %v1965_v3 = vsel %vm326_vm1, %v1952_v56, 0 }
 0x2bc   : > { %v1950_v53 = vpop.permute.xlu1 %1949  ;;  %v2056_v61 = vpop.permute.xlu0 %2055 }
 0x2bd   : > { %2546 = vmatmul.mubr.msk.bf16.vlgmr.msra.gmra.mrb[48].mxu1 %vm322_vm2, %v2409_v47  ;;  %v1954_v60 = vsel %vm946_vm8, %v1950_v53, %v1952_v56  ;;  %v1953_v63 = vsel %vm946_vm8, %v1948_v51, %v1950_v53 }
 0x2be   : > { %2550 = vmatpush3.bf16.msra.mxu1 %v1753_v49  ;;  %2411 = vmatmul.mubr.msk.bf16.vlgmr.msra.gmra.mrb[48].mxu0 %vm322_vm2, %v2409_v47  ;;  %v1959_v4 = vsel %vm326_vm1, %v1953_v63, 0 }
 0x2bf   : > { %1756 = vmatpush1.bf16.msra.mxu0 %v1747_v50  ;;  %2551 = vmatprep.mubr.msk.bf16.mxu1 %vm2615_vm0, %v2614_v0 }
 0x2c0   : > { %2418 = vmatprep.subr.msk.bf16.mxu0 %vm326_vm1, %v1848_v52  ;;  %2555 = vmatprep.subr.bf16.mxu1 %v2614_v0  ;;  %v2054_v59 = vpop.permute.xlu1 %2053  ;;  %v2160_v6 = vpop.permute.xlu0 %2159 }
 0x2c1   : > { %1787 = vmatprep.mubr.bf16.mxu0 %v2616_v1  ;;  %v2059_v8 = vsel %vm1053_vm9, %v2054_v59, %v2056_v61 }
 0x2c2   : > { %v2065_v11 = vsel %vm326_vm1, %v2059_v8, 0 }
 0x2c4   : > { %v2058_v2 = vpop.permute.xlu1 %2057  ;;  %v2164_v12 = vpop.permute.xlu0 %2163 }
 0x2c5   : > { %2552 = vmatmul.mubr.msk.bf16.vlgmr.msra.gmra.mrb[52].mxu1 %vm322_vm2, %v2413_v54  ;;  %v2060_v5 = vsel %vm1053_vm9, %v2056_v61, %v2058_v2  ;;  %v2071_v10 = vsel %vm326_vm1, %v2058_v2, 0  ;;  %v2177_v16 = vsel %vm326_vm1, %v2164_v12, 0 }
 0x2c6   : > { %2556 = vmatpush3.bf16.msra.mxu1 %v1859_v57  ;;  %2415 = vmatmul.mubr.msk.bf16.vlgmr.msra.gmra.mrb[52].mxu0 %vm322_vm2, %v2413_v54 }
 0x2c7   : > { %1862 = vmatpush1.bf16.msra.mxu0 %v1853_v58  ;;  %2557 = vmatprep.mubr.msk.bf16.mxu1 %vm2615_vm0, %v2614_v0 }
 0x2c8   : > { %2422 = vmatprep.subr.msk.bf16.mxu0 %vm326_vm1, %v1954_v60  ;;  %2561 = vmatprep.subr.bf16.mxu1 %v2614_v0  ;;  %v2162_v9 = vpop.permute.xlu1 %2161 }
 0x2c9   : > { %1893 = vmatprep.mubr.bf16.mxu0 %v2616_v1  ;;  %v2166_v13 = vsel %vm1160_vm10, %v2162_v9, %v2164_v12  ;;  %v2165_v15 = vsel %vm1160_vm10, %v2160_v6, %v2162_v9 }
 0x2ca   : > { %v2171_v17 = vsel %vm326_vm1, %v2165_v15, 0 }
 0x2cd   : > { %2558 = vmatmul.mubr.msk.bf16.vlgmr.msra.gmra.mrb[56].mxu1 %vm322_vm2, %v2417_v62 }
 0x2ce   : > { %2562 = vmatpush3.bf16.msra.mxu1 %v1965_v3  ;;  %2419 = vmatmul.mubr.msk.bf16.vlgmr.msra.gmra.mrb[56].mxu0 %vm322_vm2, %v2417_v62 }
 0x2cf   : > { %1968 = vmatpush1.bf16.msra.mxu0 %v1959_v4  ;;  %2563 = vmatprep.mubr.msk.bf16.mxu1 %vm2615_vm0, %v2614_v0 }
 0x2d0   : > { %2426 = vmatprep.subr.msk.bf16.mxu0 %vm326_vm1, %v2060_v5  ;;  %2567 = vmatprep.subr.bf16.mxu1 %v2614_v0 }
 0x2d1   : > { %1999 = vmatprep.mubr.bf16.mxu0 %v2616_v1 }
 0x2d5   : > { %2564 = vmatmul.mubr.msk.bf16.vlgmr.msra.gmra.mrb[60].mxu1 %vm322_vm2, %v2421_v7 }
 0x2d6   : > { %2568 = vmatpush3.bf16.msra.mxu1 %v2071_v10  ;;  %2423 = vmatmul.mubr.msk.bf16.vlgmr.msra.gmra.mrb[60].mxu0 %vm322_vm2, %v2421_v7 }
 0x2d7   : > { %2074 = vmatpush1.bf16.msra.mxu0 %v2065_v11  ;;  %2569 = vmatprep.mubr.msk.bf16.mxu1 %vm2615_vm0, %v2614_v0 }
 0x2d8   : > { %2430 = vmatprep.subr.msk.bf16.mxu0 %vm326_vm1, %v2166_v13  ;;  %2573 = vmatprep.subr.bf16.mxu1 %v2614_v0 }
 0x2d9   : > { %2105 = vmatprep.mubr.bf16.mxu0 %v2616_v1 }
 0x2dd   : > { %2570 = vmatmul.mubr.msk.bf16.vlgmr.msra.gmra.mrb[64].mxu1 %vm322_vm2, %v2425_v14 }
 0x2de   : > { %2574 = vmatpush3.bf16.msra.mxu1 %v2177_v16  ;;  %2427 = vmatmul.mubr.msk.bf16.vlgmr.msra.gmra.mrb[64].mxu0 %vm322_vm2, %v2425_v14 }
 0x2df   : > { %2180 = vmatpush1.bf16.msra.mxu0 %v2171_v17  ;;  %2575 = vmatprep.mubr.msk.bf16.mxu1 %vm2615_vm0, %v2614_v0 }
 0x2e0   : > { %2211 = vmatprep.mubr.bf16.mxu0 %v2616_v1 }
 0x2e5   : > { %2576 = vmatmul.mubr.msk.bf16.vlgmr.msra.gmra.mrb[68].mxu1 %vm322_vm2, %v2429_v18 }
 0x2e6   : > { %2431 = vmatmul.mubr.msk.bf16.vlgmr.msra.gmra.mrb[68].mxu0 %vm322_vm2, %v2429_v18 }
 0x378   : > { %v1422_v19 = vpop.f32.mrb[36].mxu1 }
 0x379   : > { %v1381_v20 = vpop.f32.mrb[36].mxu0  ;;  %v2529_v21 = vpop.f32.mrb[37].mxu1 }
 0x37a   : > { %v1383_v22 = vpop.f32.mrb[37].mxu0  ;;  %v1425_v23 = vpop.f32.mrb[38].mxu1 }
 0x37b   : > { %v1385_v24 = vpop.f32.mrb[38].mxu0  ;;  %v2530_v25 = vpop.f32.mrb[39].mxu1 }
 0x37c   : > { %v1386_v26 = vpop.f32.mrb[39].mxu0 }
 0x380   : > { %v1515_v27 = vpop.f32.mrb[40].mxu1 }
 0x381   : > { %v1516_v0 = vadd.f32 %v1515_v27, %v1422_v19  ;;  %v1474_v28 = vpop.f32.mrb[40].mxu0  ;;  %v2535_v1 = vpop.f32.mrb[41].mxu1 }
 0x382   : > { %v1475_v29 = vadd.f32 %v1474_v28, %v1381_v20  ;;  %v1476_v30 = vpop.f32.mrb[41].mxu0  ;;  %v1518_v31 = vpop.f32.mrb[42].mxu1 }
 0x383   : > { %v1477_v32 = vadd.f32 %v1476_v30, %v1383_v22  ;;  %v1478_v33 = vpop.f32.mrb[42].mxu0  ;;  %v2536_v34 = vpop.f32.mrb[43].mxu1 }
 0x384   : > { %v1479_v35 = vpop.f32.mrb[43].mxu0 }
 0x388   : > { %v1618_v36 = vpop.f32.mrb[44].mxu1 }
 0x389   : > { %v1626_v37 = vadd.f32 %v1618_v36, %v1516_v0  ;;  %v1577_v38 = vpop.f32.mrb[44].mxu0  ;;  %v2541_v39 = vpop.f32.mrb[45].mxu1 }
 0x38a   : > { %v1624_v40 = vadd.f32 %v1577_v38, %v1475_v29  ;;  %v1579_v41 = vpop.f32.mrb[45].mxu0  ;;  %v1621_v42 = vpop.f32.mrb[46].mxu1 }
 0x38b   : > { %v1625_v43 = vadd.f32 %v1579_v41, %v1477_v32  ;;  %v1581_v44 = vpop.f32.mrb[46].mxu0  ;;  %v2542_v45 = vpop.f32.mrb[47].mxu1 }
 0x38c   : > { %v1582_v46 = vpop.f32.mrb[47].mxu0  ;;  %v2270_v39 = vpop.permute.xlu1 %2269  ;;  %v2265_v45 = vld [vmem:[%s293_s9 + $0x10] sm:$0xff] }
 0x390   : > { %v1724_v47 = vpop.f32.mrb[48].mxu1 }
 0x391   : > { %v1732_v48 = vadd.f32 %v1724_v47, %v1626_v37  ;;  %v1683_v49 = vpop.f32.mrb[48].mxu0  ;;  %v2547_v50 = vpop.f32.mrb[49].mxu1 }
 0x392   : > { %v1730_v51 = vadd.f32 %v1683_v49, %v1624_v40  ;;  %v1685_v52 = vpop.f32.mrb[49].mxu0  ;;  %v1727_v53 = vpop.f32.mrb[50].mxu1 }
 0x393   : > { %v1731_v54 = vadd.f32 %v1685_v52, %v1625_v43  ;;  %v1687_v55 = vpop.f32.mrb[50].mxu0  ;;  %v2548_v56 = vpop.f32.mrb[51].mxu1  ;;  %v2264_v52 = vld [vmem:[%s293_s9 + $0x8] sm:$0xff] }
 0x394   : > { %v1688_v57 = vpop.f32.mrb[51].mxu0 }
 0x398   : > { %v1830_v58 = vpop.f32.mrb[52].mxu1 }
 0x399   : > { %v1838_v59 = vadd.f32 %v1830_v58, %v1732_v48  ;;  %v1789_v60 = vpop.f32.mrb[52].mxu0  ;;  %v2553_v61 = vpop.f32.mrb[53].mxu1  ;;  %v2263_v48 = vld [vmem:[%s293_s9] sm:$0xff] }
 0x39a   : > { %v1836_v62 = vadd.f32 %v1789_v60, %v1730_v51  ;;  %v1791_v63 = vpop.f32.mrb[53].mxu0  ;;  %v1833_v2 = vpop.f32.mrb[54].mxu1 }
 0x39b   : > { %v1837_v3 = vadd.f32 %v1791_v63, %v1731_v54  ;;  %v1793_v4 = vpop.f32.mrb[54].mxu0  ;;  %v2554_v5 = vpop.f32.mrb[55].mxu1 }
 0x39c   : > { %v1794_v6 = vpop.f32.mrb[55].mxu0 }
 0x3a0   : > { %v1936_v7 = vpop.f32.mrb[56].mxu1 }
 0x3a1   : > { %v1944_v8 = vadd.f32 %v1936_v7, %v1838_v59  ;;  %v1895_v9 = vpop.f32.mrb[56].mxu0  ;;  %v2559_v10 = vpop.f32.mrb[57].mxu1 }
 0x3a2   : > { %v1942_v11 = vadd.f32 %v1895_v9, %v1836_v62  ;;  %v1897_v12 = vpop.f32.mrb[57].mxu0  ;;  %v1939_v13 = vpop.f32.mrb[58].mxu1 }
 0x3a3   : > { %v1943_v14 = vadd.f32 %v1897_v12, %v1837_v3  ;;  %v1899_v15 = vpop.f32.mrb[58].mxu0  ;;  %v2560_v16 = vpop.f32.mrb[59].mxu1 }
 0x3a4   : > { %v1900_v17 = vpop.f32.mrb[59].mxu0 }
 0x3a8   : > { %v2042_v18 = vpop.f32.mrb[60].mxu1 }
 0x3a9   : > { %v2050_v19 = vadd.f32 %v2042_v18, %v1944_v8  ;;  %v2001_v20 = vpop.f32.mrb[60].mxu0  ;;  %v2565_v21 = vpop.f32.mrb[61].mxu1 }
 0x3aa   : > { %v2048_v22 = vadd.f32 %v2001_v20, %v1942_v11  ;;  %v2003_v23 = vpop.f32.mrb[61].mxu0  ;;  %v2045_v24 = vpop.f32.mrb[62].mxu1 }
 0x3ab   : > { %v2049_v25 = vadd.f32 %v2003_v23, %v1943_v14  ;;  %v2005_v26 = vpop.f32.mrb[62].mxu0  ;;  %v2566_v27 = vpop.f32.mrb[63].mxu1 }
 0x3ac   : > { %v2006_v0 = vpop.f32.mrb[63].mxu0 }
 0x3b0   : > { %v2148_v28 = vpop.f32.mrb[64].mxu1 }
 0x3b1   : > { %v2156_v1 = vadd.f32 %v2148_v28, %v2050_v19  ;;  %v2107_v29 = vpop.f32.mrb[64].mxu0  ;;  %v2571_v30 = vpop.f32.mrb[65].mxu1 }
 0x3b2   : > { %v2154_v31 = vadd.f32 %v2107_v29, %v2048_v22  ;;  %v2109_v32 = vpop.f32.mrb[65].mxu0  ;;  %v2151_v33 = vpop.f32.mrb[66].mxu1 }
 0x3b3   : > { %v2155_v34 = vadd.f32 %v2109_v32, %v2049_v25  ;;  %v2111_v35 = vpop.f32.mrb[66].mxu0  ;;  %v2572_v36 = vpop.f32.mrb[67].mxu1 }
 0x3b4   : > { %v2112_v37 = vpop.f32.mrb[67].mxu0 }
 0x3b8   : > { %v2254_v38 = vpop.f32.mrb[68].mxu1 }
 0x3b9   : > { %v2262_v40 = vadd.f32 %v2254_v38, %v2156_v1  ;;  %v2213_v41 = vpop.f32.mrb[68].mxu0  ;;  %v2577_v42 = vpop.f32.mrb[69].mxu1 }
 0x3ba   : > { %v2260_v43 = vadd.f32 %v2213_v41, %v2154_v31  ;;  %v2215_v44 = vpop.f32.mrb[69].mxu0  ;;  %v2257_v46 = vpop.f32.mrb[70].mxu1 }
 0x3bb   : > { %v2261_v47 = vadd.f32 %v2215_v44, %v2155_v34  ;;  %v2274_v49 = vadd.f32 %v2270_v39, %v2262_v40  ;;  %v2217_v50 = vpop.f32.mrb[70].mxu0  ;;  %v2578_v51 = vpop.f32.mrb[71].mxu1 }
 0x3bc   : > { %v2272_v53 = vadd.f32 %v2270_v39, %v2260_v43  ;;  %v2218_v54 = vpop.f32.mrb[71].mxu0 }
 0x3bd   : > { %v2273_v55 = vadd.f32 %v2270_v39, %v2261_v47  ;;  %v2277_v56 = vadd.f32 %v2274_v49, %v2265_v45 }
 0x3be   : > { %v2275_v57 = vadd.f32 %v2272_v53, %v2263_v48 }
 0x3bf   : > { %v2276_v58 = vadd.f32 %v2273_v55, %v2264_v52  ;;  %v2280_v59 = vmax.f32 %v2277_v56, 0.0 }
 0x3c0   : > { %v2278_v60 = vmax.f32 %v2275_v57, 0.0 }
 0x3c1   : > { %v2279_v61 = vmax.f32 %v2276_v58, 0.0  ;;  %2284 = vst.msk [vmem:[%s298_s11 + $0x10] sm:$0xff] %vm2283_vm15, %v2280_v59 }
 0x3c2   : > { %2281 = vst [vmem:[%s298_s11] sm:$0xff] %v2278_v60 }
 0x3c3   : > { %2282 = vst [vmem:[%s298_s11 + $0x8] sm:$0xff] %v2279_v61 }
 0x3c4 PF: > { %s17_s24 = sadd.s32 1, %s2612_s24  }
 0x3c5   : > { %p14_p4 = scmp.ge.s32.totalorder %s17_s24, 4  }
 0x3c7   :  { %16 = sbr.rel (!%p14_p4) target bundleno = 1 (0x1), region = 97 }

</bundles_post_ra>
